<compile_context>
chip_gen: v7x
topology: tpu7x:2x2x1
jax: 0.10.0
libtpu: 0.0.40
codegen_flags: <defaults>
</compile_context>

<pallas_src>
import functools
import math

import jax
import jax.numpy as jnp
from jax.experimental import pallas as pl
from jax.experimental.pallas import tpu as pltpu


def _round_up(x, m):
    return ((x + m - 1) // m) * m


def _mlp_kernel(num_hidden_layers, compute_dtype,
                x_ref, w_in_ref, b_in_ref, w_hid_ref, b_hid_ref,
                w_o_ref, b_o_ref, o_ref):
    # Hoist bias / shared-weight reads out of the unrolled loop so each
    # broadcast happens exactly once (JAX does not CSE broadcast_in_dim).
    b_in = b_in_ref[...]
    b_hid = b_hid_ref[...]
    b_o = b_o_ref[...]
    w_hid = w_hid_ref[...]

    # f32 -> bf16 cast happens here (VPU work hidden under the tile DMA), so
    # the x tile crosses HBM exactly once, as f32, with no wrapper-side pass.
    x = x_ref[...].astype(compute_dtype)

    # fc_in + relu: bf16 operands, f32 accumulate on the MXU.
    h = jnp.dot(x, w_in_ref[...], preferred_element_type=jnp.float32) + b_in
    h = jnp.maximum(h, 0.0)

    # Shared hidden layer applied num_hidden_layers times (the PyTorch module
    # reuses self.fc_hid inside its loop).
    for _ in range(num_hidden_layers):
        h = jnp.dot(h.astype(compute_dtype), w_hid,
                    preferred_element_type=jnp.float32) + b_hid
        h = jnp.maximum(h, 0.0)

    # fc_o (no activation); cast only at the store.
    o_ref[...] = (jnp.dot(h.astype(compute_dtype), w_o_ref[...],
                          preferred_element_type=jnp.float32) + b_o
                  ).astype(o_ref.dtype)


def _pick_batch_tile(b, batch_tile):
    if batch_tile is None:
        batch_tile = 1024 if b >= 8 * 1024 else 512
    # v7x megacore: cap the tile at ~half the batch (rounded to a multiple of
    # 8) so the "parallel" grid axis has >= 2 steps whenever possible.
    half = _round_up(-(-b // 2), 8)
    return max(8, min(batch_tile, half))


def autoencoder0_forward(x, params, input_shape, output_shape,
                         num_hidden_layers=2,
                         compute_dtype=jnp.bfloat16,
                         out_dtype=jnp.float32,
                         batch_tile=None):
    """x: (B, *input_shape) float32 (NCHW for image-like inputs)."""
    w_in, b_in, w_hid, b_hid, w_o, b_o = params
    d_in = math.prod(input_shape)
    d_out = math.prod(output_shape)
    hdim = w_in.shape[1]
    b = x.shape[0]

    x_isz = x.dtype.itemsize
    o_isz = jnp.dtype(out_dtype).itemsize
    c_isz = jnp.dtype(compute_dtype).itemsize

    tb = _pick_batch_tile(b, batch_tile)

    def vmem_estimate(tb_):
        # Double-buffered x / out tiles + (conservatively double-buffered)
        # resident weights + f32 intermediates in the body.
        act = 2 * tb_ * d_in * x_isz + 2 * tb_ * d_out * o_isz
        wts = 2 * (d_in * hdim + hdim * hdim + hdim * d_out) * c_isz
        bias = 2 * (2 * hdim + d_out) * 4
        tmp = 2 * tb_ * max(hdim, d_out) * 4
        return act + wts + bias + tmp

    # Keep the budget <= ~40 MiB so the limit below stays under v7x's 64 MiB
    # physical VMEM (v5e/v6e have 128 MiB and are never the binding case).
    while vmem_estimate(tb) > 40 * 1024 * 1024 and tb > 8:
        tb = max(8, _round_up(tb // 2, 8))
    vmem_limit = int(min(48 * 1024 * 1024,
                         max(32 * 1024 * 1024, vmem_estimate(tb) * 5 // 4)))

    # Row-major flatten (identical to torch .view).  No cast, no pad: the
    # kernel casts x, and Pallas masks the ragged last batch block.
    x2d = x.reshape(b, d_in)

    # Cast weights once in the wrapper; biases stay f32.
    w_in_c = w_in.astype(compute_dtype)
    w_hid_c = w_hid.astype(compute_dtype)
    w_o_c = w_o.astype(compute_dtype)

    kernel = functools.partial(_mlp_kernel, num_hidden_layers, compute_dtype)

    flops = int(2 * b * (d_in * hdim
                         + num_hidden_layers * hdim * hdim
                         + hdim * d_out))
    bytes_accessed = int(
        b * d_in * x_isz
        + sum(a.size * a.dtype.itemsize
              for a in (w_in_c, b_in, w_hid_c, b_hid, w_o_c, b_o))
        + b * d_out * o_isz)

    out2d = pl.pallas_call(
        kernel,
        out_shape=jax.ShapeDtypeStruct((b, d_out), out_dtype),
        grid=(pl.cdiv(b, tb),),
        in_specs=[
            pl.BlockSpec((tb, d_in), lambda i: (i, 0)),     # x tile: pipelined
            pl.BlockSpec((d_in, hdim), lambda i: (0, 0)),   # weights resident
            pl.BlockSpec((1, hdim), lambda i: (0, 0)),
            pl.BlockSpec((hdim, hdim), lambda i: (0, 0)),
            pl.BlockSpec((1, hdim), lambda i: (0, 0)),
            pl.BlockSpec((hdim, d_out), lambda i: (0, 0)),
            pl.BlockSpec((1, d_out), lambda i: (0, 0)),
        ],
        out_specs=pl.BlockSpec((tb, d_out), lambda i: (i, 0)),
        compiler_params=pltpu.CompilerParams(
            dimension_semantics=("parallel",),
            vmem_limit_bytes=vmem_limit,
        ),
        cost_estimate=pl.CostEstimate(flops=flops, transcendentals=0,
                                      bytes_accessed=bytes_accessed),
    )(x2d, w_in_c, b_in, w_hid_c, b_hid, w_o_c, b_o)

    return out2d.reshape(b, *output_shape)


def init_params(key, input_shape, output_shape, hidden_layer_width=256):
    """Deterministic synthetic parameters (float32 master copies).

    Weights are stored as (in_features, out_features) — i.e. the transpose of
    torch.nn.Linear.weight — so the kernel can do x @ W directly.
    Biases are stored as (1, out_features) to keep everything 2-D on TPU.
    """
    d_in = math.prod(input_shape)
    d_out = math.prod(output_shape)
    h = hidden_layer_width

    k1, k2, k3, k4, k5, k6 = jax.random.split(key, 6)
    scale_in = 1.0 / (d_in ** 0.5)
    scale_h = 1.0 / (h ** 0.5)
    w_in = jax.random.uniform(k1, (d_in, h), jnp.float32, -scale_in, scale_in)
    b_in = jax.random.uniform(k2, (1, h), jnp.float32, -scale_in, scale_in)
    w_hid = jax.random.uniform(k3, (h, h), jnp.float32, -scale_h, scale_h)
    b_hid = jax.random.uniform(k4, (1, h), jnp.float32, -scale_h, scale_h)
    w_o = jax.random.uniform(k5, (h, d_out), jnp.float32, -scale_h, scale_h)
    b_o = jax.random.uniform(k6, (1, d_out), jnp.float32, -scale_h, scale_h)
    return (w_in, b_in, w_hid, b_hid, w_o, b_o)


def reference_forward(x, params, input_shape, output_shape,
                      num_hidden_layers=2):
    """Pure-JAX f32 reference matching the PyTorch forward."""
    w_in, b_in, w_hid, b_hid, w_o, b_o = params
    d_in = math.prod(input_shape)
    h = jnp.maximum(x.reshape(x.shape[0], d_in) @ w_in + b_in, 0.0)
    for _ in range(num_hidden_layers):
        h = jnp.maximum(h @ w_hid + b_hid, 0.0)
    out = h @ w_o + b_o
    return out.reshape(x.shape[0], *output_shape)


if __name__ == "__main__":
    # Small shapes consistent with the module: autoencoder on (4, 16, 16).
    input_shape = (4, 16, 16)
    output_shape = (4, 16, 16)
    hidden_layer_width = 256
    num_hidden_layers = 2
    batch = 2

    key = jax.random.PRNGKey(0)
    k_x, k_p = jax.random.split(key)
    x = jax.random.normal(k_x, (batch,) + input_shape, dtype=jnp.float32)
    params = init_params(k_p, input_shape, output_shape, hidden_layer_width)

    out = autoencoder0_forward(x, params, input_shape, output_shape,
                               num_hidden_layers)
    out = jax.block_until_ready(out)

    ref = reference_forward(x, params, input_shape, output_shape,
                            num_hidden_layers)
    assert out.shape == (batch,) + output_shape
    # bf16 operands / f32 accumulation -> loosened tolerance vs f32 reference.
    assert jnp.allclose(out, ref, atol=2e-2, rtol=2e-2)

    print("KERNEL_OK")
</pallas_src>

<mosaic_0001>
module attributes {stable_mosaic.version = 11 : i64} {
  func.func @_mlp_kernel(%arg0: i32, %arg1: memref<8x1024xf32, #tpu.memory_space<vmem>>, %arg2: memref<1024x256xbf16, #tpu.memory_space<vmem>>, %arg3: memref<1x256xf32, #tpu.memory_space<vmem>>, %arg4: memref<256x256xbf16, #tpu.memory_space<vmem>>, %arg5: memref<1x256xf32, #tpu.memory_space<vmem>>, %arg6: memref<256x1024xbf16, #tpu.memory_space<vmem>>, %arg7: memref<1x1024xf32, #tpu.memory_space<vmem>>, %arg8: memref<8x1024xf32, #tpu.memory_space<vmem>>) attributes {dimension_semantics = [#tpu.dimension_semantics<parallel>], iteration_bounds = array<i64: 1>, scalar_prefetch = 0 : i64, scratch_operands = 0 : i64, tpu.core_type = #tpu.core_type<tc>, window_params = [{transform_indices = @transform_0, window_bounds = array<i64: 8, 1024>}, {pipeline_mode = #tpu.pipeline_mode<synchronous>, transform_indices = @transform_1, window_bounds = array<i64: 1024, 256>}, {pipeline_mode = #tpu.pipeline_mode<synchronous>, transform_indices = @transform_2, window_bounds = array<i64: 1, 256>}, {pipeline_mode = #tpu.pipeline_mode<synchronous>, transform_indices = @transform_3, window_bounds = array<i64: 256, 256>}, {pipeline_mode = #tpu.pipeline_mode<synchronous>, transform_indices = @transform_4, window_bounds = array<i64: 1, 256>}, {pipeline_mode = #tpu.pipeline_mode<synchronous>, transform_indices = @transform_5, window_bounds = array<i64: 256, 1024>}, {pipeline_mode = #tpu.pipeline_mode<synchronous>, transform_indices = @transform_6, window_bounds = array<i64: 1, 1024>}, {transform_indices = @transform_7, window_bounds = array<i64: 8, 1024>}]} {
    %c0 = arith.constant 0 : index
    %c0_0 = arith.constant 0 : index
    %0 = vector.load %arg3[%c0, %c0_0] : memref<1x256xf32, #tpu.memory_space<vmem>>, vector<1x256xf32>
    %c0_1 = arith.constant 0 : index
    %c0_2 = arith.constant 0 : index
    %1 = vector.load %arg5[%c0_1, %c0_2] : memref<1x256xf32, #tpu.memory_space<vmem>>, vector<1x256xf32>
    %c0_3 = arith.constant 0 : index
    %c0_4 = arith.constant 0 : index
    %2 = vector.load %arg7[%c0_3, %c0_4] : memref<1x1024xf32, #tpu.memory_space<vmem>>, vector<1x1024xf32>
    %c0_5 = arith.constant 0 : index
    %c0_6 = arith.constant 0 : index
    %3 = vector.load %arg4[%c0_5, %c0_6] : memref<256x256xbf16, #tpu.memory_space<vmem>>, vector<256x256xbf16>
    %c0_7 = arith.constant 0 : index
    %c0_8 = arith.constant 0 : index
    %4 = vector.load %arg1[%c0_7, %c0_8] : memref<8x1024xf32, #tpu.memory_space<vmem>>, vector<8x1024xf32>
    %5 = arith.truncf %4 : vector<8x1024xf32> to vector<8x1024xbf16>
    %c0_9 = arith.constant 0 : index
    %c0_10 = arith.constant 0 : index
    %6 = vector.load %arg2[%c0_9, %c0_10] : memref<1024x256xbf16, #tpu.memory_space<vmem>>, vector<1024x256xbf16>
    %cst = arith.constant dense<0.000000e+00> : vector<8x256xf32>
    %7 = tpu.matmul %5, %6, %cst {dimension_numbers = #tpu.dot_dimension_numbers<[1], [0], [0], [1], [0, 0, 1, 1], [], []>} : vector<8x1024xbf16>, vector<1024x256xbf16>, vector<8x256xf32> -> vector<8x256xf32>
    %8 = vector.broadcast %0 : vector<1x256xf32> to vector<8x256xf32>
    %9 = arith.addf %7, %8 : vector<8x256xf32>
    %cst_11 = arith.constant 0.000000e+00 : f32
    %10 = vector.broadcast %cst_11 : f32 to vector<8x256xf32>
    %11 = arith.maximumf %9, %10 : vector<8x256xf32>
    %12 = arith.truncf %11 : vector<8x256xf32> to vector<8x256xbf16>
    %cst_12 = arith.constant dense<0.000000e+00> : vector<8x256xf32>
    %13 = tpu.matmul %12, %3, %cst_12 {dimension_numbers = #tpu.dot_dimension_numbers<[1], [0], [0], [1], [0, 0, 1, 1], [], []>} : vector<8x256xbf16>, vector<256x256xbf16>, vector<8x256xf32> -> vector<8x256xf32>
    %14 = vector.broadcast %1 : vector<1x256xf32> to vector<8x256xf32>
    %15 = arith.addf %13, %14 : vector<8x256xf32>
    %cst_13 = arith.constant 0.000000e+00 : f32
    %16 = vector.broadcast %cst_13 : f32 to vector<8x256xf32>
    %17 = arith.maximumf %15, %16 : vector<8x256xf32>
    %18 = arith.truncf %17 : vector<8x256xf32> to vector<8x256xbf16>
    %cst_14 = arith.constant dense<0.000000e+00> : vector<8x256xf32>
    %19 = tpu.matmul %18, %3, %cst_14 {dimension_numbers = #tpu.dot_dimension_numbers<[1], [0], [0], [1], [0, 0, 1, 1], [], []>} : vector<8x256xbf16>, vector<256x256xbf16>, vector<8x256xf32> -> vector<8x256xf32>
    %20 = vector.broadcast %1 : vector<1x256xf32> to vector<8x256xf32>
    %21 = arith.addf %19, %20 : vector<8x256xf32>
    %cst_15 = arith.constant 0.000000e+00 : f32
    %22 = vector.broadcast %cst_15 : f32 to vector<8x256xf32>
    %23 = arith.maximumf %21, %22 : vector<8x256xf32>
    %24 = arith.truncf %23 : vector<8x256xf32> to vector<8x256xbf16>
    %c0_16 = arith.constant 0 : index
    %c0_17 = arith.constant 0 : index
    %25 = vector.load %arg6[%c0_16, %c0_17] : memref<256x1024xbf16, #tpu.memory_space<vmem>>, vector<256x1024xbf16>
    %cst_18 = arith.constant dense<0.000000e+00> : vector<8x1024xf32>
    %26 = tpu.matmul %24, %25, %cst_18 {dimension_numbers = #tpu.dot_dimension_numbers<[1], [0], [0], [1], [0, 0, 1, 1], [], []>} : vector<8x256xbf16>, vector<256x1024xbf16>, vector<8x1024xf32> -> vector<8x1024xf32>
    %27 = vector.broadcast %2 : vector<1x1024xf32> to vector<8x1024xf32>
    %28 = arith.addf %26, %27 : vector<8x1024xf32>
    %c0_19 = arith.constant 0 : index
    %c0_20 = arith.constant 0 : index
    %29 = vector.load %arg8[%c0_19, %c0_20] : memref<8x1024xf32, #tpu.memory_space<vmem>>, vector<8x1024xf32>
    tpu.vector_store %arg8[%c0_19, %c0_20], %28 {strides = array<i32>} : memref<8x1024xf32, #tpu.memory_space<vmem>>, vector<8x1024xf32>,
    return
  }
  func.func @transform_0(%arg0: i32) -> (i32, i32) {
    %c0_i32 = arith.constant 0 : i32
    %c0_i32_0 = arith.constant 0 : i32
    return %arg0, %c0_i32 : i32, i32
  }
  func.func @transform_1(%arg0: i32) -> (i32, i32) {
    %c0_i32 = arith.constant 0 : i32
    %c0_i32_0 = arith.constant 0 : i32
    %c0_i32_1 = arith.constant 0 : i32
    return %c0_i32, %c0_i32_0 : i32, i32
  }
  func.func @transform_2(%arg0: i32) -> (i32, i32) {
    %c0_i32 = arith.constant 0 : i32
    %c0_i32_0 = arith.constant 0 : i32
    %c0_i32_1 = arith.constant 0 : i32
    return %c0_i32, %c0_i32_0 : i32, i32
  }
  func.func @transform_3(%arg0: i32) -> (i32, i32) {
    %c0_i32 = arith.constant 0 : i32
    %c0_i32_0 = arith.constant 0 : i32
    %c0_i32_1 = arith.constant 0 : i32
    return %c0_i32, %c0_i32_0 : i32, i32
  }
  func.func @transform_4(%arg0: i32) -> (i32, i32) {
    %c0_i32 = arith.constant 0 : i32
    %c0_i32_0 = arith.constant 0 : i32
    %c0_i32_1 = arith.constant 0 : i32
    return %c0_i32, %c0_i32_0 : i32, i32
  }
  func.func @transform_5(%arg0: i32) -> (i32, i32) {
    %c0_i32 = arith.constant 0 : i32
    %c0_i32_0 = arith.constant 0 : i32
    %c0_i32_1 = arith.constant 0 : i32
    return %c0_i32, %c0_i32_0 : i32, i32
  }
  func.func @transform_6(%arg0: i32) -> (i32, i32) {
    %c0_i32 = arith.constant 0 : i32
    %c0_i32_0 = arith.constant 0 : i32
    %c0_i32_1 = arith.constant 0 : i32
    return %c0_i32, %c0_i32_0 : i32, i32
  }
  func.func @transform_7(%arg0: i32) -> (i32, i32) {
    %c0_i32 = arith.constant 0 : i32
    %c0_i32_0 = arith.constant 0 : i32
    return %arg0, %c0_i32 : i32, i32
  }
}

</mosaic_0001>

<bundles_post_ra>
// kernel: tpu_custom_call.1
= control target key start
LH: loop header
LB: loop body
LE: loop exit
PB: predicated region body
PF: predicated region fallthrough
CT: control target
= control target key end

     0   :  { %12 = vsyncpa [#allocation3], 0  ;;  %s3543_s0 = inlined_call_operand.hbm [shape: f32[2,1024], index: 0, kind: input, shape index: {}]   ;;  %s3544_s1 = inlined_call_operand.hbm [shape: bf16[1024,256], index: 1, kind: input, shape index: {}]   ;;  %s3545_s2 = inlined_call_operand.vmem [shape: f32[1,256], index: 2, kind: input, shape index: {}]   ;;  %s3546_s3 = inlined_call_operand.hbm [shape: bf16[256,256], index: 3, kind: input, shape index: {}]   ;;  %s3547_s4 = inlined_call_operand.vmem [shape: f32[1,256], index: 4, kind: input, shape index: {}]   ;;  %s3548_s5 = inlined_call_operand.hbm [shape: bf16[256,1024], index: 5, kind: input, shape index: {}]   ;;  %s3549_s6 = inlined_call_operand.vmem [shape: f32[1,1024], index: 6, kind: input, shape index: {}]   ;;  %s3550_s7 = inlined_call_operand.hbm [shape: f32[2,1024], index: 7, kind: output, shape index: {}]  }
   0x1   :  { %13 = vsyncpa [#allocation6], 0 }
   0x2   :  { %14 = vsyncpa [#allocation9], 0 }
   0x3   :  { %15 = vsyncpa [#allocation4], 0 }
   0x4   :  { %20 = vsyncadd [#allocation3], 768  ;;  %s3201_s24 = smov [#allocation5]   ;;  %s3083_s28 = scalar_lea.hbm %s3544_s1, 16384 }
   0x5   :  { %s33_s25 = sshll.u32 %s3201_s24, 4  ;;  %p3084_p0 = scmp.ne.s32.totalorder %s3544_s1, %s3083_s28  ;;  %s34_s25 = int_to_ptr.vmem [resolvable:$true] %s33_s25 }
   0x6   :  { %p3087_p1 = scmp.lt.u32.totalorder %s3083_s28, %s3544_s1 }
   0x8   :  { %p3089_p2 = pnand %p3087_p1, %p3084_p0 }
   0xa   :  { %3092 = shalt.err (!%p3089_p2)
}
   0xb   :  { %s3093_s10 = scalar_lea.vmem %s34_s25, 16384  ;;  %p3098_p4 = scmp.lt.s32.totalorder %s34_s25, %s34_s25 }
   0xc   :  { %p3094_p3 = scmp.ne.s32.totalorder %s34_s25, %s3093_s10  ;;  %p3099_p5 = scmp.lt.s32.totalorder %s3093_s10, %s3093_s10 }
   0xe   :  { %p3100_p6 = por %p3099_p5, %p3098_p4 }
  0x10   :  { %p3101_p7 = pnand %p3100_p6, %p3094_p3 }
  0x12   :  { %3104 = shalt.err (!%p3101_p7)
}
  0x13   :  { %s3202_s11 = smov 128   ;;  %s3203_s12 = smov 8  }
  0x14   :  { %39 = dma.hbm_to_vmem [thread:$0]  %s3544_s1, 16384, %s34_s25, [#allocation6], %s3202_s11, %s3202_s11, %s3203_s12  }
  0x15   :  { %s3204_s15 = smov [#allocation2]   ;;  %s3105_s19 = scalar_lea.hbm %s3543_s0, 256 }
  0x16   :  { %s21_s16 = sshll.u32 %s3204_s15, 4  ;;  %p3106_p8 = scmp.ne.s32.totalorder %s3543_s0, %s3105_s19  ;;  %s22_s16 = int_to_ptr.vmem [resolvable:$true] %s21_s16 }
  0x17   :  { %p3109_p9 = scmp.lt.u32.totalorder %s3105_s19, %s3543_s0 }
  0x19   :  { %p3111_p10 = pnand %p3109_p9, %p3106_p8 }
  0x1b   :  { %3114 = shalt.err (!%p3111_p10)
}
  0x1c   :  { %s3115_s24 = scalar_lea.vmem %s22_s16, 256  ;;  %s3119_s1 = scalar_lea.vmem %s22_s16, 1024 }
  0x1d   :  { %p3116_p11 = scmp.ne.s32.totalorder %s22_s16, %s3115_s24  ;;  %p3120_p12 = scmp.lt.s32.totalorder %s22_s16, %s22_s16 }
  0x1e   :  { %p3121_p13 = scmp.lt.s32.totalorder %s3119_s1, %s3115_s24 }
  0x20   :  { %p3122_p0 = por %p3121_p13, %p3120_p12 }
  0x22   :  { %p3123_p1 = pnand %p3122_p0, %p3116_p11 }
  0x24   :  { %3126 = shalt.err (!%p3123_p1)
}
  0x25   :  { %s3205_s25 = smov 256   ;;  %s3206_s26 = smov 16  }
  0x26   :  { %27 = dma.hbm_to_vmem [thread:$0]  %s3543_s0, 256, %s22_s16, [#allocation3], %s3205_s25, %s3205_s25, %s3206_s26  }
  0x27   :  { %s3207_s29 = smov [#allocation7]   ;;  %s3208_s8 = smov [#allocation8]  }
  0x28   :  { %s47_s30 = sshll.u32 %s3207_s29, 4  ;;  %s61_s9 = sshll.u32 %s3208_s8, 4  ;;  %s48_s30 = int_to_ptr.vmem [resolvable:$true] %s47_s30  ;;  %s3283_s9 = int_to_ptr.vmem [resolvable:$true] %s61_s9 }
  0x29   :  { %s3127_s14 = scalar_lea.hbm %s3546_s3, 4096 }
  0x2a   :  { %p3128_p2 = scmp.ne.s32.totalorder %s3546_s3, %s3127_s14  ;;  %p3131_p3 = scmp.lt.u32.totalorder %s3127_s14, %s3546_s3 }
  0x2c   :  { %p3133_p4 = pnand %p3131_p3, %p3128_p2 }
  0x2e   :  { %3136 = shalt.err (!%p3133_p4)
}
  0x2f   :  { %s3137_s0 = scalar_lea.vmem %s48_s30, 4096  ;;  %p3142_p6 = scmp.lt.s32.totalorder %s48_s30, %s48_s30 }
  0x30   :  { %p3138_p5 = scmp.ne.s32.totalorder %s48_s30, %s3137_s0  ;;  %p3143_p7 = scmp.lt.s32.totalorder %s3137_s0, %s3137_s0 }
  0x32   :  { %p3144_p8 = por %p3143_p7, %p3142_p6 }
  0x34   :  { %p3145_p9 = pnand %p3144_p8, %p3138_p5 }
  0x36   :  { %3148 = shalt.err (!%p3145_p9)
}
  0x37   :  { %53 = dma.hbm_to_vmem [thread:$0]  %s3546_s3, 4096, %s48_s30, [#allocation6], %s3202_s11, %s3202_s11, %s3203_s12  }
  0x38   :  { %s3149_s23 = scalar_lea.hbm %s3548_s5, 16384 }
  0x39   :  { %p3150_p10 = scmp.ne.s32.totalorder %s3548_s5, %s3149_s23  ;;  %p3153_p11 = scmp.lt.u32.totalorder %s3149_s23, %s3548_s5 }
  0x3b   :  { %p3155_p12 = pnand %p3153_p11, %p3150_p10 }
  0x3d   :  { %3158 = shalt.err (!%p3155_p12)
}
  0x3e   :  { %s3159_s29 = scalar_lea.vmem %s3283_s9, 16384  ;;  %p3164_p0 = scmp.lt.s32.totalorder %s3283_s9, %s3283_s9 }
  0x3f   :  { %p3160_p13 = scmp.ne.s32.totalorder %s3283_s9, %s3159_s29  ;;  %p3165_p1 = scmp.lt.s32.totalorder %s3159_s29, %s3159_s29 }
  0x41   :  { %p3166_p2 = por %p3165_p1, %p3164_p0 }
  0x43   :  { %p3167_p3 = pnand %p3166_p2, %p3160_p13 }
  0x45   :  { %3170 = shalt.err (!%p3167_p3)
}
  0x46   :  { %s3209_s3 = smov 512   ;;  %s3210_s11 = smov 32  }
  0x47   :  { %67 = dma.hbm_to_vmem [thread:$0]  %s3548_s5, 16384, %s3283_s9, [#allocation9], %s3209_s3, %s3209_s3, %s3210_s11  }
  0x48   :  { %3193 = dma.done.wait [#allocation3], 1024  }
  0x49   :  { %3194 = vsyncadd [#allocation3], 4294966272 }
  0x4a   :  { %3195 = dma.done.wait [#allocation6], 20480  }
  0x4b   :  { %3196 = vsyncadd [#allocation6], 4294946816 }
  0x4c   :  { %3197 = dma.done.wait [#allocation9], 16384  }
  0x4d   :  { %3198 = vsyncadd [#allocation9], 4294950912  ;;  %v2831_v0 = vld [vmem:[#allocation5 + $0x4] ss:$8 sps:$4 sm:$0xff]   ;;  %v2833_v1 = vld [vmem:[#allocation5] ss:$8 sps:$4 sm:$0xff]   ;;  %v140_v11 = vlaneseq }
  0x4e   :  { %1000 = vmatprep.subr.bf16.mxu0 %v2831_v0  ;;  %v2834_v2 = vld [vmem:[#allocation5 + $0x14] ss:$8 sps:$4 sm:$0xff]   ;;  %v2836_v3 = vld [vmem:[#allocation5 + $0x10] ss:$8 sps:$4 sm:$0xff]   ;;  %v2837_v4 = vld [vmem:[#allocation5 + $0x24] ss:$8 sps:$4 sm:$0xff]  }
  0x4f   :  { %1001 = vmatpush1.bf16.msra.mxu0 %v2833_v1  ;;  %v2839_v5 = vld [vmem:[#allocation5 + $0x20] ss:$8 sps:$4 sm:$0xff]   ;;  %v2840_v6 = vld [vmem:[#allocation5 + $0x34] ss:$8 sps:$4 sm:$0xff]   ;;  %v2842_v7 = vld [vmem:[#allocation5 + $0x30] ss:$8 sps:$4 sm:$0xff]  }
  0x50   :  { %1002 = vmatprep.subr.bf16.mxu0 %v2834_v2  ;;  %v2843_v8 = vld [vmem:[#allocation5 + $0x44] ss:$8 sps:$4 sm:$0xff]   ;;  %v3211_v9 = vmov 1983009808   ;;  %v2845_v12 = vld [vmem:[#allocation5 + $0x40] ss:$8 sps:$4 sm:$0xff]  }
  0x51   :  { %v138_v10 = vunpack.c.l.s4 %v3211_v9  ;;  %v2846_v13 = vld [vmem:[#allocation5 + $0x54] ss:$8 sps:$4 sm:$0xff]   ;;  %v3317_v15 = vshrl.u32 %v140_v11, 7  ;;  %v2848_v16 = vld [vmem:[#allocation5 + $0x50] ss:$8 sps:$4 sm:$0xff]  }
  0x52   :  { %v2849_v17 = vld [vmem:[#allocation5 + $0x64] ss:$8 sps:$4 sm:$0xff]   ;;  %v2851_v19 = vld [vmem:[#allocation5 + $0x60] ss:$8 sps:$4 sm:$0xff]   ;;  %v2852_v24 = vld [vmem:[#allocation5 + $0x74] ss:$8 sps:$4 sm:$0xff]  }
  0x53   :  { %1003 = vmatpush1.bf16.msra.mxu0 %v2836_v3  ;;  %v139_v14 = vunpack.c.0.s8 %v138_v10  ;;  %v2879_v20 = vld [vmem:[#allocation2] ss:$16 sps:$4 sm:$0xff]   ;;  %v2881_v21 = vld [vmem:[#allocation2 + $0x4] ss:$16 sps:$4 sm:$0xff]   ;;  %v2981_v58 = vld [vmem:[#allocation2 + $0x8] ss:$16 sps:$4 sm:$0xff]  }
  0x54   :  { %1004 = vmatprep.subr.bf16.mxu0 %v2837_v4  ;;  %v2882_v22 = vld [vmem:[#allocation2 + $0x20] ss:$16 sps:$4 sm:$0xff]   ;;  %v2884_v23 = vld [vmem:[#allocation2 + $0x24] ss:$16 sps:$4 sm:$0xff]   ;;  %v2983_v59 = vld [vmem:[#allocation2 + $0x28] ss:$16 sps:$4 sm:$0xff]  }
  0x55   :  { %v3320_v18 = vsub.s32 %v139_v14, %v3317_v15  ;;  %v2854_v29 = vld [vmem:[#allocation5 + $0x70] ss:$8 sps:$4 sm:$0xff]   ;;  %v2855_v32 = vld [vmem:[#allocation5 + $0x84] ss:$8 sps:$4 sm:$0xff]   ;;  %v2857_v34 = vld [vmem:[#allocation5 + $0x80] ss:$8 sps:$4 sm:$0xff]  }
  0x56   :  { %v2858_v35 = vld [vmem:[#allocation5 + $0x94] ss:$8 sps:$4 sm:$0xff]   ;;  %v2860_v36 = vld [vmem:[#allocation5 + $0x90] ss:$8 sps:$4 sm:$0xff]   ;;  %v2861_v37 = vld [vmem:[#allocation5 + $0xa4] ss:$8 sps:$4 sm:$0xff]  }
  0x57   :  { %1005 = vmatpush1.bf16.msra.mxu0 %v2839_v5  ;;  %v143_v25 = vrot.slane %v2879_v20, %v3320_v18  ;;  %v157_v26 = vrot.slane %v2882_v22, %v3320_v18  ;;  %v150_v27 = vrot.slane %v2881_v21, %v3320_v18  ;;  %v164_v28 = vrot.slane %v2884_v23, %v3320_v18  ;;  %v2863_v38 = vld [vmem:[#allocation5 + $0xa0] ss:$8 sps:$4 sm:$0xff]   ;;  %v2864_v39 = vld [vmem:[#allocation5 + $0xb4] ss:$8 sps:$4 sm:$0xff]   ;;  %v2866_v40 = vld [vmem:[#allocation5 + $0xb0] ss:$8 sps:$4 sm:$0xff]  }
  0x58   :  { %1006 = vmatprep.subr.bf16.mxu0 %v2840_v6  ;;  %v2867_v41 = vld [vmem:[#allocation5 + $0xc4] ss:$8 sps:$4 sm:$0xff]   ;;  %v2869_v42 = vld [vmem:[#allocation5 + $0xc0] ss:$8 sps:$4 sm:$0xff]   ;;  %v2870_v43 = vld [vmem:[#allocation5 + $0xd4] ss:$8 sps:$4 sm:$0xff]   ;;  %v179_v60 = vrot.slane %v2981_v58, %v3320_v18  ;;  %v193_v61 = vrot.slane %v2983_v59, %v3320_v18 }
  0x59   :  { %v166_v30 = vcombine.high %v143_v25, %v157_v26  ;;  %v3326_v31 = vcombine.low %v150_v27, %v164_v28  ;;  %v2872_v44 = vld [vmem:[#allocation5 + $0xd0] ss:$8 sps:$4 sm:$0xff]   ;;  %v2873_v45 = vld [vmem:[#allocation5 + $0xe4] ss:$8 sps:$4 sm:$0xff]   ;;  %v2875_v46 = vld [vmem:[#allocation5 + $0xe0] ss:$8 sps:$4 sm:$0xff]   ;;  %v165_v48 = vcombine.low %v143_v25, %v157_v26  ;;  %v168_v50 = vcombine.high %v150_v27, %v164_v28 }
  0x5a   :  { %v2876_v47 = vld [vmem:[#allocation5 + $0xf4] ss:$8 sps:$4 sm:$0xff]   ;;  %v2878_v49 = vld [vmem:[#allocation5 + $0xf0] ss:$8 sps:$4 sm:$0xff]   ;;  %v2887_v51 = vld [vmem:[#allocation5 + $0x104] ss:$8 sps:$4 sm:$0xff]   ;;  %v3330_v0 = vcombine.low %v179_v60, %v193_v61 }
  0x5b   :  { %1007 = vmatpush1.bf16.msra.mxu0 %v2842_v7  ;;  %v214_v33 = vpack.c.bf16 %v166_v30, %v166_v30  ;;  %v213_v52 = vpack.c.bf16 %v165_v48, %v165_v48  ;;  %v2885_v53 = vld [vmem:[#allocation5 + $0x100] ss:$8 sps:$4 sm:$0xff]   ;;  %v216_v54 = vpack.c.bf16 %v168_v50, %v168_v50  ;;  %v2890_v55 = vld [vmem:[#allocation5 + $0x114] ss:$8 sps:$4 sm:$0xff]   ;;  %v2888_v56 = vld [vmem:[#allocation5 + $0x110] ss:$8 sps:$4 sm:$0xff]   ;;  %v202_v30 = vcombine.high %v179_v60, %v193_v61 }
  0x5c   :  { %1008 = vmatprep.subr.bf16.mxu0 %v2843_v8  ;;  %v2893_v57 = vld [vmem:[#allocation5 + $0x124] ss:$8 sps:$4 sm:$0xff]   ;;  %v2891_v62 = vld [vmem:[#allocation5 + $0x120] ss:$8 sps:$4 sm:$0xff]   ;;  %v2896_v63 = vld [vmem:[#allocation5 + $0x134] ss:$8 sps:$4 sm:$0xff]  }
  0x5d   :  { %1032 = vmatprep.mubr.bf16.mxu0 %v214_v33  ;;  %v2894_v1 = vld [vmem:[#allocation5 + $0x130] ss:$8 sps:$4 sm:$0xff]   ;;  %v2899_v2 = vld [vmem:[#allocation5 + $0x144] ss:$8 sps:$4 sm:$0xff]   ;;  %v2897_v3 = vld [vmem:[#allocation5 + $0x140] ss:$8 sps:$4 sm:$0xff]  }
  0x5e   :  { %v2902_v4 = vld [vmem:[#allocation5 + $0x154] ss:$8 sps:$4 sm:$0xff]   ;;  %v2900_v5 = vld [vmem:[#allocation5 + $0x150] ss:$8 sps:$4 sm:$0xff]   ;;  %v2905_v6 = vld [vmem:[#allocation5 + $0x164] ss:$8 sps:$4 sm:$0xff]  }
  0x5f   :  { %1009 = vmatpush1.bf16.msra.mxu0 %v2845_v12  ;;  %v2903_v7 = vld [vmem:[#allocation5 + $0x160] ss:$8 sps:$4 sm:$0xff]   ;;  %v2908_v8 = vld [vmem:[#allocation5 + $0x174] ss:$8 sps:$4 sm:$0xff]   ;;  %v2906_v9 = vld [vmem:[#allocation5 + $0x170] ss:$8 sps:$4 sm:$0xff]  }
  0x60   :  { %1010 = vmatprep.subr.bf16.mxu0 %v2846_v13  ;;  %v2911_v10 = vld [vmem:[#allocation5 + $0x184] ss:$8 sps:$4 sm:$0xff]   ;;  %v2909_v11 = vld [vmem:[#allocation5 + $0x180] ss:$8 sps:$4 sm:$0xff]   ;;  %v2914_v12 = vld [vmem:[#allocation5 + $0x194] ss:$8 sps:$4 sm:$0xff]  }
  0x61   :  { %v2912_v13 = vld [vmem:[#allocation5 + $0x190] ss:$8 sps:$4 sm:$0xff]   ;;  %v2917_v14 = vld [vmem:[#allocation5 + $0x1a4] ss:$8 sps:$4 sm:$0xff]   ;;  %v2921_v21 = vld [vmem:[#allocation5 + $0x1c0] ss:$8 sps:$4 sm:$0xff]  }
  0x62   :  { %v2923_v20 = vld [vmem:[#allocation5 + $0x1c4] ss:$8 sps:$4 sm:$0xff]   ;;  %v2926_v22 = vld [vmem:[#allocation5 + $0x1d4] ss:$8 sps:$4 sm:$0xff]   ;;  %v2924_v23 = vld [vmem:[#allocation5 + $0x1d0] ss:$8 sps:$4 sm:$0xff]  }
  0x63   :  { %1011 = vmatpush1.bf16.msra.mxu0 %v2848_v16  ;;  %v2915_v16 = vld [vmem:[#allocation5 + $0x1a0] ss:$8 sps:$4 sm:$0xff]   ;;  %v2932_v26 = vld [vmem:[#allocation5 + $0x1f4] ss:$8 sps:$4 sm:$0xff]   ;;  %v2942_v50 = vld [vmem:[#allocation5 + $0x230] ss:$8 sps:$4 sm:$0xff]  }
  0x64   :  { %1012 = vmatprep.subr.bf16.mxu0 %v2849_v17  ;;  %v2920_v17 = vld [vmem:[#allocation5 + $0x1b4] ss:$8 sps:$4 sm:$0xff]   ;;  %v2927_v25 = vld [vmem:[#allocation5 + $0x1e0] ss:$8 sps:$4 sm:$0xff]   ;;  %v2948_v58 = vld [vmem:[#allocation5 + $0x250] ss:$8 sps:$4 sm:$0xff]  }
  0x65   :  { %v3033_v27 = vld [vmem:[#allocation2 + $0xc] ss:$16 sps:$4 sm:$0xff]   ;;  %v3358_v48 = vld [vmem:[#allocation7 + $0x20] ss:$8 sps:$4 sm:$0xff]   ;;  %v3376_v60 = vld [vmem:[#allocation7 + $0x50] ss:$8 sps:$4 sm:$0xff]  }
  0x66   :  { %v3034_v28 = vld [vmem:[#allocation2 + $0x2c] ss:$16 sps:$4 sm:$0xff]  }
  0x67   :  { %1013 = vmatpush1.bf16.msra.mxu0 %v2851_v19  ;;  %v2918_v19 = vld [vmem:[#allocation5 + $0x1b0] ss:$8 sps:$4 sm:$0xff]   ;;  %v3336_v33 = vrot.slane %v3034_v28, %v3320_v18  ;;  %v2953_v59 = vld [vmem:[#allocation5 + $0x264] ss:$8 sps:$4 sm:$0xff]   ;;  %v3421_v28 = vld [vmem:[#allocation7 + $0xd4] ss:$8 sps:$4 sm:$0xff]  }
  0x68   :  { %1014 = vmatprep.subr.bf16.mxu0 %v2852_v24  ;;  %v2929_v24 = vld [vmem:[#allocation5 + $0x1e4] ss:$8 sps:$4 sm:$0xff]  }
  0x69   :  { %v3379_v61 = vld [vmem:[#allocation7 + $0x64] ss:$8 sps:$4 sm:$0xff]  }
  0x6b   :  { %1015 = vmatpush1.bf16.msra.mxu0 %v2854_v29  ;;  %v2930_v29 = vld [vmem:[#allocation5 + $0x1f0] ss:$8 sps:$4 sm:$0xff]  }
  0x6c   :  { %1016 = vmatprep.subr.bf16.mxu0 %v2855_v32  ;;  %v3333_v32 = vrot.slane %v3033_v27, %v3320_v18  ;;  %v3418_v27 = vld [vmem:[#allocation7 + $0xc0] ss:$8 sps:$4 sm:$0xff]  }
  0x6f   :  { %1017 = vmatpush1.bf16.msra.mxu0 %v2857_v34  ;;  %v2935_v34 = vld [vmem:[#allocation5 + $0x204] ss:$8 sps:$4 sm:$0xff]  }
  0x70   :  { %1018 = vmatprep.subr.bf16.mxu0 %v2858_v35  ;;  %v215_v35 = vpack.c.bf16 %v3326_v31, %v3326_v31  ;;  %v2941_v31 = vld [vmem:[#allocation5 + $0x224] ss:$8 sps:$4 sm:$0xff]  }
  0x73   :  { %1019 = vmatpush1.bf16.msra.mxu0 %v2860_v36  ;;  %v3342_v36 = vcombine.low %v3333_v32, %v3336_v33 }
  0x74   :  { %1020 = vmatprep.subr.bf16.mxu0 %v2861_v37  ;;  %v2933_v37 = vld [vmem:[#allocation5 + $0x200] ss:$8 sps:$4 sm:$0xff]  }
  0x77   :  { %1021 = vmatpush1.bf16.msra.mxu0 %v2863_v38  ;;  %v218_v38 = vpack.c.bf16 %v202_v30, %v202_v30  ;;  %v2977_v30 = vld [vmem:[#allocation5 + $0x2e4] ss:$8 sps:$4 sm:$0xff]  }
  0x78   :  { %1022 = vmatprep.subr.bf16.mxu0 %v2864_v39  ;;  %v2938_v39 = vld [vmem:[#allocation5 + $0x214] ss:$8 sps:$4 sm:$0xff]  }
  0x7b   :  { %1023 = vmatpush1.bf16.msra.mxu0 %v2866_v40  ;;  %v3344_v40 = vld [vmem:[#allocation7 + $0x4] ss:$8 sps:$4 sm:$0xff]  }
  0x7c   :  { %1024 = vmatprep.subr.bf16.mxu0 %v2867_v41  ;;  %v3346_v41 = vld [vmem:[#allocation7] ss:$8 sps:$4 sm:$0xff]   ;;  %1339 = vmatprep.subr.bf16.mxu1 %v3344_v40 }
  0x7d   :  { %1340 = vmatpush1.bf16.msra.mxu1 %v3346_v41 }
  0x7f   :  { %1025 = vmatpush1.bf16.msra.mxu0 %v2869_v42  ;;  %v3348_v42 = vld [vmem:[#allocation7 + $0x14] ss:$8 sps:$4 sm:$0xff]  }
  0x80   :  { %1026 = vmatprep.subr.bf16.mxu0 %v2870_v43  ;;  %v2936_v43 = vld [vmem:[#allocation5 + $0x210] ss:$8 sps:$4 sm:$0xff]   ;;  %1341 = vmatprep.subr.bf16.mxu1 %v3348_v42 }
  0x83   :  { %1027 = vmatpush1.bf16.msra.mxu0 %v2872_v44  ;;  %v3352_v44 = vld [vmem:[#allocation7 + $0x10] ss:$8 sps:$4 sm:$0xff]  }
  0x84   :  { %1028 = vmatprep.subr.bf16.mxu0 %v2873_v45  ;;  %v3355_v45 = vld [vmem:[#allocation7 + $0x24] ss:$8 sps:$4 sm:$0xff]   ;;  %1342 = vmatpush1.bf16.msra.mxu1 %v3352_v44 }
  0x85   :  { %1343 = vmatprep.subr.bf16.mxu1 %v3355_v45 }
  0x87   :  { %1029 = vmatpush1.bf16.msra.mxu0 %v2875_v46  ;;  %v2939_v46 = vld [vmem:[#allocation5 + $0x220] ss:$8 sps:$4 sm:$0xff]  }
  0x88   :  { %1030 = vmatprep.subr.bf16.mxu0 %v2876_v47  ;;  %v2944_v47 = vld [vmem:[#allocation5 + $0x234] ss:$8 sps:$4 sm:$0xff]   ;;  %1344 = vmatpush1.bf16.msra.mxu1 %v3358_v48 }
  0x8b   :  { %1031 = vmatpush1.bf16.msra.mxu0 %v2878_v49  ;;  %v3361_v49 = vld [vmem:[#allocation7 + $0x34] ss:$8 sps:$4 sm:$0xff]  }
  0x8c   :  { %1041 = vmatprep.subr.bf16.mxu0 %v2887_v51  ;;  %v2947_v51 = vld [vmem:[#allocation5 + $0x244] ss:$8 sps:$4 sm:$0xff]   ;;  %1345 = vmatprep.subr.bf16.mxu1 %v3361_v49 }
  0x8e   :  { %1033 = vmatmul.mubr.bf16.vlgmr.msra.gmra.mrb[0].mxu0 %v213_v52  ;;  %v3364_v52 = vld [vmem:[#allocation7 + $0x30] ss:$8 sps:$4 sm:$0xff]  }
  0x8f   :  { %1042 = vmatpush1.bf16.msra.mxu0 %v2885_v53  ;;  %1073 = vmatprep.mubr.bf16.mxu0 %v216_v54  ;;  %v3367_v53 = vld [vmem:[#allocation7 + $0x44] ss:$8 sps:$4 sm:$0xff]   ;;  %v2945_v54 = vld [vmem:[#allocation5 + $0x240] ss:$8 sps:$4 sm:$0xff]  }
  0x90   :  { %1043 = vmatprep.subr.bf16.mxu0 %v2890_v55  ;;  %v2950_v55 = vld [vmem:[#allocation5 + $0x254] ss:$8 sps:$4 sm:$0xff]   ;;  %1346 = vmatpush1.bf16.msra.mxu1 %v3364_v52 }
  0x91   :  { %1347 = vmatprep.subr.bf16.mxu1 %v3367_v53 }
  0x93   :  { %1044 = vmatpush1.bf16.msra.mxu0 %v2888_v56  ;;  %v3370_v56 = vld [vmem:[#allocation7 + $0x40] ss:$8 sps:$4 sm:$0xff]  }
  0x94   :  { %1045 = vmatprep.subr.bf16.mxu0 %v2893_v57  ;;  %v3373_v57 = vld [vmem:[#allocation7 + $0x54] ss:$8 sps:$4 sm:$0xff]   ;;  %1348 = vmatpush1.bf16.msra.mxu1 %v3370_v56 }
  0x95   :  { %1349 = vmatprep.subr.bf16.mxu1 %v3373_v57 }
  0x97   :  { %1046 = vmatpush1.bf16.msra.mxu0 %v2891_v62  ;;  %v2951_v62 = vld [vmem:[#allocation5 + $0x260] ss:$8 sps:$4 sm:$0xff]  }
  0x98   :  { %1047 = vmatprep.subr.bf16.mxu0 %v2896_v63  ;;  %v2956_v63 = vld [vmem:[#allocation5 + $0x274] ss:$8 sps:$4 sm:$0xff]   ;;  %1350 = vmatpush1.bf16.msra.mxu1 %v3376_v60 }
  0x99   :  { %1351 = vmatprep.subr.bf16.mxu1 %v3379_v61 }
  0x9b   :  { %1048 = vmatpush1.bf16.msra.mxu0 %v2894_v1  ;;  %v3382_v1 = vld [vmem:[#allocation7 + $0x60] ss:$8 sps:$4 sm:$0xff]  }
  0x9c   :  { %1049 = vmatprep.subr.bf16.mxu0 %v2899_v2  ;;  %v3385_v2 = vld [vmem:[#allocation7 + $0x74] ss:$8 sps:$4 sm:$0xff]   ;;  %1352 = vmatpush1.bf16.msra.mxu1 %v3382_v1 }
  0x9d   :  { %1353 = vmatprep.subr.bf16.mxu1 %v3385_v2 }
  0x9f   :  { %1050 = vmatpush1.bf16.msra.mxu0 %v2897_v3  ;;  %v2954_v3 = vld [vmem:[#allocation5 + $0x270] ss:$8 sps:$4 sm:$0xff]  }
  0xa0   :  { %1051 = vmatprep.subr.bf16.mxu0 %v2902_v4  ;;  %v2959_v4 = vld [vmem:[#allocation5 + $0x284] ss:$8 sps:$4 sm:$0xff]  }
  0xa3   :  { %1052 = vmatpush1.bf16.msra.mxu0 %v2900_v5  ;;  %v3388_v5 = vld [vmem:[#allocation7 + $0x70] ss:$8 sps:$4 sm:$0xff]  }
  0xa4   :  { %1053 = vmatprep.subr.bf16.mxu0 %v2905_v6  ;;  %v3391_v6 = vld [vmem:[#allocation7 + $0x84] ss:$8 sps:$4 sm:$0xff]   ;;  %1354 = vmatpush1.bf16.msra.mxu1 %v3388_v5 }
  0xa5   :  { %1355 = vmatprep.subr.bf16.mxu1 %v3391_v6 }
  0xa7   :  { %1054 = vmatpush1.bf16.msra.mxu0 %v2903_v7  ;;  %v2957_v7 = vld [vmem:[#allocation5 + $0x280] ss:$8 sps:$4 sm:$0xff]  }
  0xa8   :  { %1055 = vmatprep.subr.bf16.mxu0 %v2908_v8  ;;  %v2962_v8 = vld [vmem:[#allocation5 + $0x294] ss:$8 sps:$4 sm:$0xff]  }
  0xab   :  { %1056 = vmatpush1.bf16.msra.mxu0 %v2906_v9  ;;  %v3394_v9 = vld [vmem:[#allocation7 + $0x80] ss:$8 sps:$4 sm:$0xff]  }
  0xac   :  { %1057 = vmatprep.subr.bf16.mxu0 %v2911_v10  ;;  %v3397_v10 = vld [vmem:[#allocation7 + $0x94] ss:$8 sps:$4 sm:$0xff]   ;;  %1356 = vmatpush1.bf16.msra.mxu1 %v3394_v9 }
  0xad   :  { %1357 = vmatprep.subr.bf16.mxu1 %v3397_v10 }
  0xaf   :  { %1058 = vmatpush1.bf16.msra.mxu0 %v2909_v11  ;;  %v2960_v11 = vld [vmem:[#allocation5 + $0x290] ss:$8 sps:$4 sm:$0xff]  }
  0xb0   :  { %1059 = vmatprep.subr.bf16.mxu0 %v2914_v12  ;;  %v2965_v12 = vld [vmem:[#allocation5 + $0x2a4] ss:$8 sps:$4 sm:$0xff]  }
  0xb3   :  { %1060 = vmatpush1.bf16.msra.mxu0 %v2912_v13  ;;  %v3400_v13 = vld [vmem:[#allocation7 + $0x90] ss:$8 sps:$4 sm:$0xff]  }
  0xb4   :  { %1061 = vmatprep.subr.bf16.mxu0 %v2917_v14  ;;  %v3403_v14 = vld [vmem:[#allocation7 + $0xa4] ss:$8 sps:$4 sm:$0xff]   ;;  %1358 = vmatpush1.bf16.msra.mxu1 %v3400_v13 }
  0xb5   :  { %1359 = vmatprep.subr.bf16.mxu1 %v3403_v14 }
  0xb7   :  { %1062 = vmatpush1.bf16.msra.mxu0 %v2915_v16  ;;  %v2963_v16 = vld [vmem:[#allocation5 + $0x2a0] ss:$8 sps:$4 sm:$0xff]  }
  0xb8   :  { %1063 = vmatprep.subr.bf16.mxu0 %v2920_v17  ;;  %v2968_v17 = vld [vmem:[#allocation5 + $0x2b4] ss:$8 sps:$4 sm:$0xff]  }
  0xbb   :  { %1064 = vmatpush1.bf16.msra.mxu0 %v2918_v19  ;;  %v3406_v19 = vld [vmem:[#allocation7 + $0xa0] ss:$8 sps:$4 sm:$0xff]  }
  0xbc   :  { %1065 = vmatprep.subr.bf16.mxu0 %v2923_v20  ;;  %v3409_v20 = vld [vmem:[#allocation7 + $0xb4] ss:$8 sps:$4 sm:$0xff]   ;;  %1360 = vmatpush1.bf16.msra.mxu1 %v3406_v19 }
  0xbd   :  { %1361 = vmatprep.subr.bf16.mxu1 %v3409_v20 }
  0xbf   :  { %1066 = vmatpush1.bf16.msra.mxu0 %v2921_v21  ;;  %v2966_v21 = vld [vmem:[#allocation5 + $0x2b0] ss:$8 sps:$4 sm:$0xff]  }
  0xc0   :  { %1067 = vmatprep.subr.bf16.mxu0 %v2926_v22  ;;  %v2971_v22 = vld [vmem:[#allocation5 + $0x2c4] ss:$8 sps:$4 sm:$0xff]  }
  0xc3   :  { %1068 = vmatpush1.bf16.msra.mxu0 %v2924_v23  ;;  %v3412_v23 = vld [vmem:[#allocation7 + $0xb0] ss:$8 sps:$4 sm:$0xff]  }
  0xc4   :  { %1069 = vmatprep.subr.bf16.mxu0 %v2929_v24  ;;  %v3415_v24 = vld [vmem:[#allocation7 + $0xc4] ss:$8 sps:$4 sm:$0xff]   ;;  %1362 = vmatpush1.bf16.msra.mxu1 %v3412_v23 }
  0xc5   :  { %1363 = vmatprep.subr.bf16.mxu1 %v3415_v24 }
  0xc7   :  { %1070 = vmatpush1.bf16.msra.mxu0 %v2927_v25  ;;  %v2969_v25 = vld [vmem:[#allocation5 + $0x2c0] ss:$8 sps:$4 sm:$0xff]  }
  0xc8   :  { %1071 = vmatprep.subr.bf16.mxu0 %v2932_v26  ;;  %v2974_v26 = vld [vmem:[#allocation5 + $0x2d4] ss:$8 sps:$4 sm:$0xff]   ;;  %1364 = vmatpush1.bf16.msra.mxu1 %v3418_v27 }
  0xc9   :  { %1365 = vmatprep.subr.bf16.mxu1 %v3421_v28 }
  0xcb   :  { %1072 = vmatpush1.bf16.msra.mxu0 %v2930_v29  ;;  %v2972_v29 = vld [vmem:[#allocation5 + $0x2d0] ss:$8 sps:$4 sm:$0xff]  }
  0xcc   :  { %1082 = vmatprep.subr.bf16.mxu0 %v2935_v34  ;;  %v3424_v34 = vld [vmem:[#allocation7 + $0xd0] ss:$8 sps:$4 sm:$0xff]  }
  0xcd   :  { %1366 = vmatpush1.bf16.msra.mxu1 %v3424_v34 }
  0xce   :  { %1074 = vmatmul.mubr.bf16.vlgmr.msra.gmra.mrb[0].mxu0 %v215_v35  ;;  %v2975_v35 = vld [vmem:[#allocation5 + $0x2e0] ss:$8 sps:$4 sm:$0xff]  }
  0xcf   :  { %1083 = vmatpush1.bf16.msra.mxu0 %v2933_v37  ;;  %1114 = vmatprep.mubr.bf16.mxu0 %v218_v38  ;;  %v2980_v37 = vld [vmem:[#allocation5 + $0x2f4] ss:$8 sps:$4 sm:$0xff]   ;;  %v2978_v38 = vld [vmem:[#allocation5 + $0x2f0] ss:$8 sps:$4 sm:$0xff]  }
  0xd0   :  { %1084 = vmatprep.subr.bf16.mxu0 %v2938_v39  ;;  %v204_v39 = vcombine.high %v3333_v32, %v3336_v33  ;;  %v2996_v32 = vld [vmem:[#allocation5 + $0x334] ss:$8 sps:$4 sm:$0xff]   ;;  %v2994_v33 = vld [vmem:[#allocation5 + $0x330] ss:$8 sps:$4 sm:$0xff]  }
  0xd3   :  { %1085 = vmatpush1.bf16.msra.mxu0 %v2936_v43  ;;  %v2987_v43 = vld [vmem:[#allocation5 + $0x304] ss:$8 sps:$4 sm:$0xff]  }
  0xd4   :  { %1086 = vmatprep.subr.bf16.mxu0 %v2941_v31  ;;  %v217_v31 = vpack.c.bf16 %v3330_v0, %v3330_v0  ;;  %v2997_v0 = vld [vmem:[#allocation5 + $0x340] ss:$8 sps:$4 sm:$0xff]  }
  0xd7   :  { %1087 = vmatpush1.bf16.msra.mxu0 %v2939_v46  ;;  %v2985_v46 = vld [vmem:[#allocation5 + $0x300] ss:$8 sps:$4 sm:$0xff]  }
  0xd8   :  { %1088 = vmatprep.subr.bf16.mxu0 %v2944_v47  ;;  %v220_v47 = vpack.c.bf16 %v204_v39, %v204_v39  ;;  %v3032_v39 = vld [vmem:[#allocation5 + $0x3f4] ss:$8 sps:$4 sm:$0xff]  }
  0xdb   :  { %1089 = vmatpush1.bf16.msra.mxu0 %v2942_v50  ;;  %v2990_v50 = vld [vmem:[#allocation5 + $0x314] ss:$8 sps:$4 sm:$0xff]  }
  0xdc   :  { %1090 = vmatprep.subr.bf16.mxu0 %v2947_v51  ;;  %v2988_v51 = vld [vmem:[#allocation5 + $0x310] ss:$8 sps:$4 sm:$0xff]  }
  0xdf   :  { %1091 = vmatpush1.bf16.msra.mxu0 %v2945_v54  ;;  %v2993_v54 = vld [vmem:[#allocation5 + $0x324] ss:$8 sps:$4 sm:$0xff]  }
  0xe0   :  { %1092 = vmatprep.subr.bf16.mxu0 %v2950_v55  ;;  %v2991_v55 = vld [vmem:[#allocation5 + $0x320] ss:$8 sps:$4 sm:$0xff]  }
  0xe3   :  { %1093 = vmatpush1.bf16.msra.mxu0 %v2948_v58  ;;  %v2999_v58 = vld [vmem:[#allocation5 + $0x344] ss:$8 sps:$4 sm:$0xff]  }
  0xe4   :  { %1094 = vmatprep.subr.bf16.mxu0 %v2953_v59  ;;  %v3002_v59 = vld [vmem:[#allocation5 + $0x354] ss:$8 sps:$4 sm:$0xff]  }
  0xe7   :  { %1095 = vmatpush1.bf16.msra.mxu0 %v2951_v62  ;;  %v3000_v62 = vld [vmem:[#allocation5 + $0x350] ss:$8 sps:$4 sm:$0xff]  }
  0xe8   :  { %1096 = vmatprep.subr.bf16.mxu0 %v2956_v63  ;;  %v3005_v63 = vld [vmem:[#allocation5 + $0x364] ss:$8 sps:$4 sm:$0xff]  }
  0xeb   :  { %1097 = vmatpush1.bf16.msra.mxu0 %v2954_v3  ;;  %v3003_v3 = vld [vmem:[#allocation5 + $0x360] ss:$8 sps:$4 sm:$0xff]  }
  0xec   :  { %1098 = vmatprep.subr.bf16.mxu0 %v2959_v4  ;;  %v3008_v4 = vld [vmem:[#allocation5 + $0x374] ss:$8 sps:$4 sm:$0xff]  }
  0xef   :  { %1099 = vmatpush1.bf16.msra.mxu0 %v2957_v7  ;;  %v3006_v7 = vld [vmem:[#allocation5 + $0x370] ss:$8 sps:$4 sm:$0xff]  }
  0xf0   :  { %1100 = vmatprep.subr.bf16.mxu0 %v2962_v8  ;;  %v3011_v8 = vld [vmem:[#allocation5 + $0x384] ss:$8 sps:$4 sm:$0xff]  }
  0xf3   :  { %1101 = vmatpush1.bf16.msra.mxu0 %v2960_v11  ;;  %v3009_v11 = vld [vmem:[#allocation5 + $0x380] ss:$8 sps:$4 sm:$0xff]  }
  0xf4   :  { %1102 = vmatprep.subr.bf16.mxu0 %v2965_v12  ;;  %v3014_v12 = vld [vmem:[#allocation5 + $0x394] ss:$8 sps:$4 sm:$0xff]  }
  0xf7   :  { %1103 = vmatpush1.bf16.msra.mxu0 %v2963_v16  ;;  %v3012_v16 = vld [vmem:[#allocation5 + $0x390] ss:$8 sps:$4 sm:$0xff]  }
  0xf8   :  { %1104 = vmatprep.subr.bf16.mxu0 %v2968_v17  ;;  %v3017_v17 = vld [vmem:[#allocation5 + $0x3a4] ss:$8 sps:$4 sm:$0xff]  }
  0xfb   :  { %1105 = vmatpush1.bf16.msra.mxu0 %v2966_v21  ;;  %v3015_v21 = vld [vmem:[#allocation5 + $0x3a0] ss:$8 sps:$4 sm:$0xff]  }
  0xfc   :  { %1106 = vmatprep.subr.bf16.mxu0 %v2971_v22  ;;  %v3020_v22 = vld [vmem:[#allocation5 + $0x3b4] ss:$8 sps:$4 sm:$0xff]  }
  0xff   :  { %1107 = vmatpush1.bf16.msra.mxu0 %v2969_v25  ;;  %v3018_v25 = vld [vmem:[#allocation5 + $0x3b0] ss:$8 sps:$4 sm:$0xff]  }
 0x100   :  { %1108 = vmatprep.subr.bf16.mxu0 %v2974_v26  ;;  %v3023_v26 = vld [vmem:[#allocation5 + $0x3c4] ss:$8 sps:$4 sm:$0xff]  }
 0x103   :  { %1109 = vmatpush1.bf16.msra.mxu0 %v2972_v29  ;;  %v3021_v29 = vld [vmem:[#allocation5 + $0x3c0] ss:$8 sps:$4 sm:$0xff]  }
 0x104   :  { %1110 = vmatprep.subr.bf16.mxu0 %v2977_v30  ;;  %v3026_v30 = vld [vmem:[#allocation5 + $0x3d4] ss:$8 sps:$4 sm:$0xff]  }
 0x107   :  { %1111 = vmatpush1.bf16.msra.mxu0 %v2975_v35  ;;  %v3024_v35 = vld [vmem:[#allocation5 + $0x3d0] ss:$8 sps:$4 sm:$0xff]  }
 0x108   :  { %1112 = vmatprep.subr.bf16.mxu0 %v2980_v37  ;;  %v3029_v37 = vld [vmem:[#allocation5 + $0x3e4] ss:$8 sps:$4 sm:$0xff]  }
 0x10b   :  { %1113 = vmatpush1.bf16.msra.mxu0 %v2978_v38  ;;  %v3027_v38 = vld [vmem:[#allocation5 + $0x3e0] ss:$8 sps:$4 sm:$0xff]  }
 0x10c   :  { %1123 = vmatprep.subr.bf16.mxu0 %v2987_v43  ;;  %v3030_v43 = vld [vmem:[#allocation5 + $0x3f0] ss:$8 sps:$4 sm:$0xff]  }
 0x10e   :  { %1115 = vmatmul.mubr.bf16.vlgmr.msra.gmra.mrb[0].mxu0 %v217_v31  ;;  %v219_v31 = vpack.c.bf16 %v3342_v36, %v3342_v36  ;;  %v3442_v36 = vsub.s32 1, %v3317_v15 }
 0x10f   :  { %1124 = vmatpush1.bf16.msra.mxu0 %v2985_v46  ;;  %1155 = vmatprep.mubr.bf16.mxu0 %v220_v47  ;;  %v3077_v46 = vld [vmem:[#allocation7 + $0xe4] ss:$8 sps:$4 sm:$0xff]   ;;  %v3079_v47 = vld [vmem:[#allocation7 + $0xe0] ss:$8 sps:$4 sm:$0xff]  }
 0x110   :  { %1125 = vmatprep.subr.bf16.mxu0 %v2990_v50  ;;  %1367 = vmatprep.subr.bf16.mxu1 %v3077_v46  ;;  %v3080_v50 = vld [vmem:[#allocation7 + $0xf4] ss:$8 sps:$4 sm:$0xff]  }
 0x111   :  { %1368 = vmatpush1.bf16.msra.mxu1 %v3079_v47 }
 0x112   :  { %1369 = vmatprep.subr.bf16.mxu1 %v3080_v50 }
 0x113   :  { %1126 = vmatpush1.bf16.msra.mxu0 %v2988_v51  ;;  %v3082_v51 = vld [vmem:[#allocation7 + $0xf0] ss:$8 sps:$4 sm:$0xff]  }
 0x114   :  { %1127 = vmatprep.subr.bf16.mxu0 %v2993_v54  ;;  %v3436_v54 = vsub.s32 0, %v3317_v15 }
 0x115   :  { %1370 = vmatpush1.bf16.msra.mxu1 %v3082_v51 }
 0x116   :  { %1384 = vmatprep.subr.bf16.mxu1 %v3344_v40 }
 0x117   :  { %1128 = vmatpush1.bf16.msra.mxu0 %v2991_v55  ;;  %v82_v55 = vld [vmem:[%s3545_s2] sm:$0x3] }
 0x118   :  { %1129 = vmatprep.subr.bf16.mxu0 %v2996_v32  ;;  %v353_v32 = vrot.slane %v82_v55, %v3436_v54 }
 0x11b   :  { %1130 = vmatpush1.bf16.msra.mxu0 %v2994_v33  ;;  %v357_v33 = vrot.slane %v82_v55, %v3442_v36 }
 0x11c   :  { %1131 = vmatprep.subr.bf16.mxu0 %v2999_v58 }
 0x11f   :  { %1132 = vmatpush1.bf16.msra.mxu0 %v2997_v0 }
 0x120   :  { %1133 = vmatprep.subr.bf16.mxu0 %v3002_v59 }
 0x123   :  { %1134 = vmatpush1.bf16.msra.mxu0 %v3000_v62 }
 0x124   :  { %1135 = vmatprep.subr.bf16.mxu0 %v3005_v63 }
 0x127   :  { %1136 = vmatpush1.bf16.msra.mxu0 %v3003_v3 }
 0x128   :  { %1137 = vmatprep.subr.bf16.mxu0 %v3008_v4 }
 0x12b   :  { %1138 = vmatpush1.bf16.msra.mxu0 %v3006_v7 }
 0x12c   :  { %1139 = vmatprep.subr.bf16.mxu0 %v3011_v8 }
 0x12f   :  { %1140 = vmatpush1.bf16.msra.mxu0 %v3009_v11 }
 0x130   :  { %1141 = vmatprep.subr.bf16.mxu0 %v3014_v12  ;;  %v1479_v12 = vld [vmem:[#allocation8 + $0x190] sm:$0xff] }
 0x133   :  { %1142 = vmatpush1.bf16.msra.mxu0 %v3012_v16  ;;  %v1483_v16 = vld [vmem:[#allocation8 + $0x1b0] sm:$0xff] }
 0x134   :  { %1143 = vmatprep.subr.bf16.mxu0 %v3017_v17  ;;  %v2729_v17 = vcombine.low %v1479_v12, %v1483_v16 }
 0x137   :  { %1144 = vmatpush1.bf16.msra.mxu0 %v3015_v21  ;;  %v2730_v21 = vcombine.high %v1479_v12, %v1483_v16  ;;  %v1465_v12 = vld [vmem:[#allocation8 + $0x120] sm:$0xff] }
 0x138   :  { %1145 = vmatprep.subr.bf16.mxu0 %v3020_v22  ;;  %v1487_v22 = vld [vmem:[#allocation8 + $0x1d0] sm:$0xff] }
 0x13b   :  { %1146 = vmatpush1.bf16.msra.mxu0 %v3018_v25  ;;  %v1491_v25 = vld [vmem:[#allocation8 + $0x1f0] sm:$0xff] }
 0x13c   :  { %1147 = vmatprep.subr.bf16.mxu0 %v3023_v26  ;;  %v2737_v26 = vcombine.low %v1487_v22, %v1491_v25 }
 0x13f   :  { %1148 = vmatpush1.bf16.msra.mxu0 %v3021_v29  ;;  %v2738_v29 = vcombine.high %v1487_v22, %v1491_v25  ;;  %v1473_v22 = vld [vmem:[#allocation8 + $0x160] sm:$0xff] }
 0x140   :  { %1149 = vmatprep.subr.bf16.mxu0 %v3026_v30  ;;  %v1495_v30 = vld [vmem:[#allocation8 + $0x210] sm:$0xff]  ;;  %v1481_v25 = vld [vmem:[#allocation8 + $0x1a0] sm:$0xff] }
 0x143   :  { %1150 = vmatpush1.bf16.msra.mxu0 %v3024_v35  ;;  %v1499_v35 = vld [vmem:[#allocation8 + $0x230] sm:$0xff] }
 0x144   :  { %1151 = vmatprep.subr.bf16.mxu0 %v3029_v37  ;;  %v2745_v37 = vcombine.low %v1495_v30, %v1499_v35 }
 0x147   :  { %1152 = vmatpush1.bf16.msra.mxu0 %v3027_v38  ;;  %v2746_v38 = vcombine.high %v1495_v30, %v1499_v35  ;;  %v1485_v30 = vld [vmem:[#allocation8 + $0x1c0] sm:$0xff] }
 0x148   :  { %1153 = vmatprep.subr.bf16.mxu0 %v3032_v39  ;;  %v1503_v39 = vld [vmem:[#allocation8 + $0x250] sm:$0xff]  ;;  %v1489_v35 = vld [vmem:[#allocation8 + $0x1e0] sm:$0xff] }
 0x14b   :  { %1154 = vmatpush1.bf16.msra.mxu0 %v3030_v43  ;;  %v1507_v43 = vld [vmem:[#allocation8 + $0x270] sm:$0xff] }
 0x14e   :  { %1156 = vmatmul.mubr.bf16.vlgmr.msra.gmra.mrb[0].mxu0 %v219_v31  ;;  %v2753_v31 = vcombine.low %v1503_v39, %v1507_v43 }
 0x221   :  { %v1157_v58 = vpop.f32.mrb[0].mxu0 }
 0x222   :  { %v2805_v0 = vadd.f32 %v1157_v58, %v353_v32  ;;  %v1159_v59 = vpop.f32.mrb[1].mxu0  ;;  %v1519_v32 = vld [vmem:[#allocation8 + $0x2d0] sm:$0xff] }
 0x223   :  { %v2806_v62 = vadd.f32 %v1159_v59, %v357_v33  ;;  %v1161_v63 = vpop.f32.mrb[2].mxu0  ;;  %v1523_v33 = vld [vmem:[#allocation8 + $0x2f0] sm:$0xff] }
 0x224   :  { %v1164_v40 = vmax.f32 %v2805_v0, 0.0  ;;  %v1162_v3 = vpop.f32.mrb[3].mxu0  ;;  %v2769_v58 = vcombine.low %v1519_v32, %v1523_v33  ;;  %v2770_v0 = vcombine.high %v1519_v32, %v1523_v33  ;;  %v1527_v59 = vld [vmem:[#allocation8 + $0x310] sm:$0xff]  ;;  %v1509_v32 = vld [vmem:[#allocation8 + $0x280] sm:$0xff] }
 0x225   :  { %v1165_v4 = vmax.f32 %v2806_v62, 0.0  ;;  %v1531_v62 = vld [vmem:[#allocation8 + $0x330] sm:$0xff]  ;;  %v1513_v33 = vld [vmem:[#allocation8 + $0x2a0] sm:$0xff] }
 0x226   :  { %v1166_v8 = vpack.c.bf16 %v1164_v40, %v1164_v40  ;;  %v2777_v63 = vcombine.low %v1527_v59, %v1531_v62  ;;  %v2778_v40 = vcombine.high %v1527_v59, %v1531_v62  ;;  %v1535_v3 = vld [vmem:[#allocation8 + $0x350] sm:$0xff]  ;;  %v1517_v59 = vld [vmem:[#allocation8 + $0x2c0] sm:$0xff] }
 0x227   :  { %v1167_v7 = vpack.c.bf16 %v1165_v4, %v1165_v4  ;;  %v1539_v4 = vld [vmem:[#allocation8 + $0x370] sm:$0xff]  ;;  %v1521_v62 = vld [vmem:[#allocation8 + $0x2e0] sm:$0xff] }
 0x229   :  { %1371 = vmatprep.mubr.bf16.mxu1 %v1167_v7  ;;  %v2785_v7 = vcombine.low %v1535_v3, %v1539_v4 }
 0x22a   :  { %1372 = vmatmul.mubr.bf16.vlgmr.msra.gmra.mrb[0].mxu1 %v1166_v8  ;;  %v2786_v8 = vcombine.high %v1535_v3, %v1539_v4  ;;  %v1525_v3 = vld [vmem:[#allocation8 + $0x300] sm:$0xff] }
 0x22b   :  { %1385 = vmatpush1.bf16.msra.mxu1 %v3346_v41  ;;  %v3473_v41 = vld [vmem:[#allocation8] sm:$0xff] }
 0x22c   :  { %1386 = vmatprep.subr.bf16.mxu1 %v3348_v42  ;;  %v3475_v42 = vld [vmem:[#allocation8 + $0x20] sm:$0xff] }
 0x22d   :  { %v1529_v4 = vld [vmem:[#allocation8 + $0x320] sm:$0xff] }
 0x22f   :  { %1387 = vmatpush1.bf16.msra.mxu1 %v3352_v44  ;;  %v2677_v44 = vcombine.low %v3473_v41, %v3475_v42 }
 0x230   :  { %1388 = vmatprep.subr.bf16.mxu1 %v3355_v45  ;;  %v2678_v45 = vcombine.high %v3473_v41, %v3475_v42 }
 0x233   :  { %1389 = vmatpush1.bf16.msra.mxu1 %v3358_v48  ;;  %v1431_v48 = vld [vmem:[#allocation8 + $0x10] sm:$0xff] }
 0x234   :  { %1390 = vmatprep.subr.bf16.mxu1 %v3361_v49  ;;  %v1435_v49 = vld [vmem:[#allocation8 + $0x30] sm:$0xff] }
 0x237   :  { %1391 = vmatpush1.bf16.msra.mxu1 %v3364_v52  ;;  %v2681_v52 = vcombine.low %v1431_v48, %v1435_v49 }
 0x238   :  { %1392 = vmatprep.subr.bf16.mxu1 %v3367_v53  ;;  %v2682_v53 = vcombine.high %v1431_v48, %v1435_v49 }
 0x23a   :  { %2320 = vmatprep.subr.bf16.mxu0 %v2682_v53 }
 0x23b   :  { %1393 = vmatpush1.bf16.msra.mxu1 %v3370_v56  ;;  %2321 = vmatpush1.bf16.msra.mxu0 %v2681_v52  ;;  %v1439_v56 = vld [vmem:[#allocation8 + $0x50] sm:$0xff] }
 0x23c   :  { %1394 = vmatprep.subr.bf16.mxu1 %v3373_v57  ;;  %v1443_v57 = vld [vmem:[#allocation8 + $0x70] sm:$0xff] }
 0x23f   :  { %1395 = vmatpush1.bf16.msra.mxu1 %v3376_v60  ;;  %v2689_v60 = vcombine.low %v1439_v56, %v1443_v57 }
 0x240   :  { %1396 = vmatprep.subr.bf16.mxu1 %v3379_v61  ;;  %v2690_v61 = vcombine.high %v1439_v56, %v1443_v57 }
 0x242   :  { %2322 = vmatprep.subr.bf16.mxu0 %v2690_v61 }
 0x243   :  { %1397 = vmatpush1.bf16.msra.mxu1 %v3382_v1  ;;  %2323 = vmatpush1.bf16.msra.mxu0 %v2689_v60  ;;  %v1447_v1 = vld [vmem:[#allocation8 + $0x90] sm:$0xff] }
 0x244   :  { %1398 = vmatprep.subr.bf16.mxu1 %v3385_v2  ;;  %v1451_v2 = vld [vmem:[#allocation8 + $0xb0] sm:$0xff] }
 0x247   :  { %1399 = vmatpush1.bf16.msra.mxu1 %v3388_v5  ;;  %v2697_v5 = vcombine.low %v1447_v1, %v1451_v2 }
 0x248   :  { %1400 = vmatprep.subr.bf16.mxu1 %v3391_v6  ;;  %v2698_v6 = vcombine.high %v1447_v1, %v1451_v2 }
 0x24a   :  { %2324 = vmatprep.subr.bf16.mxu0 %v2698_v6  ;;  %v1441_v6 = vld [vmem:[#allocation8 + $0x60] sm:$0xff] }
 0x24b   :  { %1401 = vmatpush1.bf16.msra.mxu1 %v3394_v9  ;;  %2325 = vmatpush1.bf16.msra.mxu0 %v2697_v5  ;;  %v1455_v9 = vld [vmem:[#allocation8 + $0xd0] sm:$0xff]  ;;  %v1437_v5 = vld [vmem:[#allocation8 + $0x40] sm:$0xff] }
 0x24c   :  { %1402 = vmatprep.subr.bf16.mxu1 %v3397_v10  ;;  %v1459_v10 = vld [vmem:[#allocation8 + $0xf0] sm:$0xff] }
 0x24f   :  { %1403 = vmatpush1.bf16.msra.mxu1 %v3400_v13  ;;  %v2705_v13 = vcombine.low %v1455_v9, %v1459_v10 }
 0x250   :  { %1404 = vmatprep.subr.bf16.mxu1 %v3403_v14  ;;  %v2706_v14 = vcombine.high %v1455_v9, %v1459_v10 }
 0x252   :  { %2326 = vmatprep.subr.bf16.mxu0 %v2706_v14  ;;  %v1445_v14 = vld [vmem:[#allocation8 + $0x80] sm:$0xff] }
 0x253   :  { %1405 = vmatpush1.bf16.msra.mxu1 %v3406_v19  ;;  %2327 = vmatpush1.bf16.msra.mxu0 %v2705_v13  ;;  %v1463_v19 = vld [vmem:[#allocation8 + $0x110] sm:$0xff]  ;;  %v2686_v13 = vcombine.high %v1437_v5, %v1441_v6 }
 0x254   :  { %1406 = vmatprep.subr.bf16.mxu1 %v3409_v20  ;;  %v1467_v20 = vld [vmem:[#allocation8 + $0x130] sm:$0xff] }
 0x257   :  { %1407 = vmatpush1.bf16.msra.mxu1 %v3412_v23  ;;  %v2713_v23 = vcombine.low %v1463_v19, %v1467_v20 }
 0x258   :  { %1408 = vmatprep.subr.bf16.mxu1 %v3415_v24  ;;  %v2714_v24 = vcombine.high %v1463_v19, %v1467_v20  ;;  %v1449_v19 = vld [vmem:[#allocation8 + $0xa0] sm:$0xff]  ;;  %v2685_v20 = vcombine.low %v1437_v5, %v1441_v6  ;;  %v1547_v5 = vld [vmem:[#allocation8 + $0x3b0] sm:$0xff] }
 0x25a   :  { %2328 = vmatprep.subr.bf16.mxu0 %v2714_v24  ;;  %v1453_v24 = vld [vmem:[#allocation8 + $0xc0] sm:$0xff] }
 0x25b   :  { %1409 = vmatpush1.bf16.msra.mxu1 %v3418_v27  ;;  %2329 = vmatpush1.bf16.msra.mxu0 %v2713_v23  ;;  %v1471_v27 = vld [vmem:[#allocation8 + $0x150] sm:$0xff]  ;;  %v2694_v23 = vcombine.high %v1445_v14, %v1449_v19 }
 0x25c   :  { %1410 = vmatprep.subr.bf16.mxu1 %v3421_v28  ;;  %v1475_v28 = vld [vmem:[#allocation8 + $0x170] sm:$0xff] }
 0x25d   :  { %v2722_v11 = vcombine.high %v1471_v27, %v1475_v28 }
 0x25f   :  { %1411 = vmatpush1.bf16.msra.mxu1 %v3424_v34  ;;  %v2721_v34 = vcombine.low %v1471_v27, %v1475_v28  ;;  %2330 = vmatprep.subr.bf16.mxu0 %v2722_v11  ;;  %v1457_v27 = vld [vmem:[#allocation8 + $0xe0] sm:$0xff]  ;;  %v2693_v28 = vcombine.low %v1445_v14, %v1449_v19 }
 0x260   :  { %1412 = vmatprep.subr.bf16.mxu1 %v3077_v46  ;;  %v2754_v46 = vcombine.high %v1503_v39, %v1507_v43  ;;  %v1461_v11 = vld [vmem:[#allocation8 + $0x100] sm:$0xff]  ;;  %v2701_v16 = vcombine.low %v1453_v24, %v1457_v27 }
 0x261   :  { %2331 = vmatpush1.bf16.msra.mxu0 %v2721_v34  ;;  %v2702_v34 = vcombine.high %v1453_v24, %v1457_v27  ;;  %v2709_v41 = vcombine.low %v1461_v11, %v1465_v12  ;;  %v1493_v39 = vld [vmem:[#allocation8 + $0x200] sm:$0xff] }
 0x262   :  { %2332 = vmatprep.subr.bf16.mxu0 %v2730_v21  ;;  %v1469_v21 = vld [vmem:[#allocation8 + $0x140] sm:$0xff] }
 0x263   :  { %1413 = vmatpush1.bf16.msra.mxu1 %v3079_v47  ;;  %v1511_v47 = vld [vmem:[#allocation8 + $0x290] sm:$0xff]  ;;  %v2718_v42 = vcombine.high %v1469_v21, %v1473_v22  ;;  %v1497_v43 = vld [vmem:[#allocation8 + $0x220] sm:$0xff] }
 0x264   :  { %1414 = vmatprep.subr.bf16.mxu1 %v3080_v50  ;;  %v1515_v50 = vld [vmem:[#allocation8 + $0x2b0] sm:$0xff]  ;;  %v1553_v14 = vld [vmem:[#allocation8 + $0x3e0] sm:$0xff] }
 0x265   :  { %2333 = vmatpush1.bf16.msra.mxu0 %v2729_v17  ;;  %v2762_v55 = vcombine.high %v1511_v47, %v1515_v50  ;;  %v2710_v17 = vcombine.high %v1461_v11, %v1465_v12  ;;  %v1434_v11 = vld [vmem:[#allocation8 + $0x28] sm:$0xff] }
 0x266   :  { %2334 = vmatprep.subr.bf16.mxu0 %v2738_v29 }
 0x267   :  { %1415 = vmatpush1.bf16.msra.mxu1 %v3082_v51  ;;  %v2761_v51 = vcombine.low %v1511_v47, %v1515_v50  ;;  %v1501_v47 = vld [vmem:[#allocation8 + $0x240] sm:$0xff] }
 0x268   :  { %2238 = vmatprep.subr.bf16.mxu1 %v2678_v45  ;;  %v83_v45 = vld [vmem:[%s3547_s4] sm:$0x3] }
 0x269   :  { %2335 = vmatpush1.bf16.msra.mxu0 %v2737_v26  ;;  %v3485_v48 = vrot.slane %v83_v45, %v3436_v54  ;;  %v3488_v49 = vrot.slane %v83_v45, %v3442_v36  ;;  %v2717_v26 = vcombine.low %v1469_v21, %v1473_v22  ;;  %v1505_v50 = vld [vmem:[#allocation8 + $0x260] sm:$0xff] }
 0x26a   :  { %2336 = vmatprep.subr.bf16.mxu0 %v2746_v38  ;;  %v2734_v38 = vcombine.high %v1485_v30, %v1489_v35  ;;  %v1533_v45 = vld [vmem:[#allocation8 + $0x340] sm:$0xff] }
 0x26d   :  { %2337 = vmatpush1.bf16.msra.mxu0 %v2745_v37 }
 0x26e   :  { %2338 = vmatprep.subr.bf16.mxu0 %v2754_v46  ;;  %v2742_v46 = vcombine.high %v1493_v39, %v1497_v43 }
 0x271   :  { %2339 = vmatpush1.bf16.msra.mxu0 %v2753_v31  ;;  %v2733_v31 = vcombine.low %v1485_v30, %v1489_v35  ;;  %v1442_v30 = vld [vmem:[#allocation8 + $0x68] sm:$0xff] }
 0x272   :  { %2340 = vmatprep.subr.bf16.mxu0 %v2762_v55  ;;  %v2750_v55 = vcombine.high %v1501_v47, %v1505_v50 }
 0x275   :  { %2341 = vmatpush1.bf16.msra.mxu0 %v2761_v51  ;;  %v2741_v51 = vcombine.low %v1493_v39, %v1497_v43  ;;  %v1446_v39 = vld [vmem:[#allocation8 + $0x88] sm:$0xff] }
 0x276   :  { %2342 = vmatprep.subr.bf16.mxu0 %v2770_v0  ;;  %v2758_v0 = vcombine.high %v1509_v32, %v1513_v33 }
 0x279   :  { %2343 = vmatpush1.bf16.msra.mxu0 %v2769_v58  ;;  %v2749_v58 = vcombine.low %v1501_v47, %v1505_v50 }
 0x27a   :  { %2344 = vmatprep.subr.bf16.mxu0 %v2778_v40  ;;  %v2766_v40 = vcombine.high %v1517_v59, %v1521_v62 }
 0x27d   :  { %2345 = vmatpush1.bf16.msra.mxu0 %v2777_v63  ;;  %v2757_v63 = vcombine.low %v1509_v32, %v1513_v33 }
 0x27e   :  { %2346 = vmatprep.subr.bf16.mxu0 %v2786_v8  ;;  %v2774_v8 = vcombine.high %v1525_v3, %v1529_v4 }
 0x281   :  { %2347 = vmatpush1.bf16.msra.mxu0 %v2785_v7  ;;  %v2765_v7 = vcombine.low %v1517_v59, %v1521_v62 }
 0x2fd   :  { %v1373_v52 = vpop.f32.mrb[0].mxu1 }
 0x2fe   :  { %v1374_v53 = vadd.f32 %v1373_v52, %v3485_v48  ;;  %v1375_v56 = vpop.f32.mrb[1].mxu1  ;;  %v1537_v52 = vld [vmem:[#allocation8 + $0x360] sm:$0xff] }
 0x2ff   :  { %v1376_v57 = vadd.f32 %v1375_v56, %v3488_v49  ;;  %v1377_v60 = vpop.f32.mrb[2].mxu1  ;;  %v2782_v56 = vcombine.high %v1533_v45, %v1537_v52 }
 0x300   :  { %v1380_v61 = vmax.f32 %v1374_v53, 0.0  ;;  %v1378_v1 = vpop.f32.mrb[3].mxu1  ;;  %v2773_v53 = vcombine.low %v1525_v3, %v1529_v4  ;;  %v1541_v60 = vld [vmem:[#allocation8 + $0x380] sm:$0xff] }
 0x301   :  { %v1381_v2 = vmax.f32 %v1376_v57, 0.0  ;;  %v2781_v57 = vcombine.low %v1533_v45, %v1537_v52 }
 0x302   :  { %v1382_v10 = vpack.c.bf16 %v1380_v61, %v1380_v61  ;;  %v1545_v61 = vld [vmem:[#allocation8 + $0x3a0] sm:$0xff] }
 0x303   :  { %v1383_v9 = vpack.c.bf16 %v1381_v2, %v1381_v2  ;;  %v2790_v1 = vcombine.high %v1541_v60, %v1545_v61  ;;  %v1543_v2 = vld [vmem:[#allocation8 + $0x390] sm:$0xff]  ;;  %v2789_v6 = vcombine.low %v1541_v60, %v1545_v61  ;;  %v1502_v61 = vld [vmem:[#allocation8 + $0x248] sm:$0xff] }
 0x305   :  { %1416 = vmatprep.mubr.bf16.mxu1 %v1383_v9  ;;  %v2794_v9 = vcombine.high %v1543_v2, %v1547_v5 }
 0x306   :  { %1417 = vmatmul.mubr.bf16.vlgmr.msra.gmra.mrb[4].mxu1 %v1382_v10  ;;  %v2793_v10 = vcombine.low %v1543_v2, %v1547_v5 }
 0x307   :  { %2239 = vmatpush1.bf16.msra.mxu1 %v2677_v44  ;;  %v1477_v44 = vld [vmem:[#allocation8 + $0x180] sm:$0xff]  ;;  %2348 = vmatprep.subr.bf16.mxu0 %v2794_v9  ;;  %v1514_v9 = vld [vmem:[#allocation8 + $0x2a8] sm:$0xff] }
 0x308   :  { %2240 = vmatprep.subr.bf16.mxu1 %v2686_v13  ;;  %v2726_v29 = vcombine.high %v1477_v44, %v1481_v25  ;;  %v2725_v37 = vcombine.low %v1477_v44, %v1481_v25  ;;  %v1549_v13 = vld [vmem:[#allocation8 + $0x3c0] sm:$0xff]  ;;  %2349 = vmatpush1.bf16.msra.mxu0 %v2793_v10 }
 0x309   :  { %v2798_v19 = vcombine.high %v1549_v13, %v1553_v14  ;;  %v2797_v24 = vcombine.low %v1549_v13, %v1553_v14  ;;  %v1518_v14 = vld [vmem:[#allocation8 + $0x2c8] sm:$0xff] }
 0x30b   :  { %2241 = vmatpush1.bf16.msra.mxu1 %v2685_v20  ;;  %v1551_v20 = vld [vmem:[#allocation8 + $0x3d0] sm:$0xff] }
 0x30c   :  { %2242 = vmatprep.subr.bf16.mxu1 %v2694_v23  ;;  %v1555_v23 = vld [vmem:[#allocation8 + $0x3f0] sm:$0xff] }
 0x30d   :  { %v2802_v27 = vcombine.high %v1551_v20, %v1555_v23 }
 0x30f   :  { %2243 = vmatpush1.bf16.msra.mxu1 %v2693_v28  ;;  %v2801_v28 = vcombine.low %v1551_v20, %v1555_v23  ;;  %2350 = vmatprep.subr.bf16.mxu0 %v2802_v27  ;;  %v1530_v27 = vld [vmem:[#allocation8 + $0x328] sm:$0xff] }
 0x310   :  { %2244 = vmatprep.subr.bf16.mxu1 %v2702_v34  ;;  %v1430_v34 = vld [vmem:[#allocation8 + $0x8] sm:$0xff] }
 0x311   :  { %2351 = vmatpush1.bf16.msra.mxu0 %v2801_v28  ;;  %v2680_v12 = vcombine.high %v1430_v34, %v1434_v11 }
 0x313   :  { %2245 = vmatpush1.bf16.msra.mxu1 %v2701_v16  ;;  %v2679_v16 = vcombine.low %v1430_v34, %v1434_v11  ;;  %v1534_v11 = vld [vmem:[#allocation8 + $0x348] sm:$0xff] }
 0x314   :  { %2246 = vmatprep.subr.bf16.mxu1 %v2710_v17 }
 0x317   :  { %2247 = vmatpush1.bf16.msra.mxu1 %v2709_v41 }
 0x318   :  { %2248 = vmatprep.subr.bf16.mxu1 %v2718_v42 }
 0x31b   :  { %2249 = vmatpush1.bf16.msra.mxu1 %v2717_v26 }
 0x31c   :  { %2250 = vmatprep.subr.bf16.mxu1 %v2726_v29  ;;  %v1438_v29 = vld [vmem:[#allocation8 + $0x48] sm:$0xff] }
 0x31f   :  { %2251 = vmatpush1.bf16.msra.mxu1 %v2725_v37 }
 0x320   :  { %2252 = vmatprep.subr.bf16.mxu1 %v2734_v38  ;;  %v2688_v38 = vcombine.high %v1438_v29, %v1442_v30 }
 0x323   :  { %2253 = vmatpush1.bf16.msra.mxu1 %v2733_v31  ;;  %v1454_v31 = vld [vmem:[#allocation8 + $0xc8] sm:$0xff] }
 0x324   :  { %2254 = vmatprep.subr.bf16.mxu1 %v2742_v46  ;;  %v1458_v46 = vld [vmem:[#allocation8 + $0xe8] sm:$0xff] }
 0x325   :  { %v2704_v50 = vcombine.high %v1454_v31, %v1458_v46  ;;  %v2703_v32 = vcombine.low %v1454_v31, %v1458_v46 }
 0x327   :  { %2255 = vmatpush1.bf16.msra.mxu1 %v2741_v51  ;;  %v1462_v51 = vld [vmem:[#allocation8 + $0x108] sm:$0xff] }
 0x328   :  { %2256 = vmatprep.subr.bf16.mxu1 %v2750_v55  ;;  %v1466_v55 = vld [vmem:[#allocation8 + $0x128] sm:$0xff] }
 0x329   :  { %v2712_v33 = vcombine.high %v1462_v51, %v1466_v55  ;;  %v2711_v59 = vcombine.low %v1462_v51, %v1466_v55 }
 0x32b   :  { %2257 = vmatpush1.bf16.msra.mxu1 %v2749_v58  ;;  %v1470_v58 = vld [vmem:[#allocation8 + $0x148] sm:$0xff] }
 0x32c   :  { %2258 = vmatprep.subr.bf16.mxu1 %v2758_v0  ;;  %v1474_v0 = vld [vmem:[#allocation8 + $0x168] sm:$0xff] }
 0x32d   :  { %v2720_v62 = vcombine.high %v1470_v58, %v1474_v0  ;;  %v2719_v3 = vcombine.low %v1470_v58, %v1474_v0 }
 0x32f   :  { %2259 = vmatpush1.bf16.msra.mxu1 %v2757_v63  ;;  %v1478_v63 = vld [vmem:[#allocation8 + $0x188] sm:$0xff] }
 0x330   :  { %2260 = vmatprep.subr.bf16.mxu1 %v2766_v40  ;;  %v1482_v40 = vld [vmem:[#allocation8 + $0x1a8] sm:$0xff] }
 0x331   :  { %v2728_v4 = vcombine.high %v1478_v63, %v1482_v40  ;;  %v2727_v45 = vcombine.low %v1478_v63, %v1482_v40 }
 0x333   :  { %2261 = vmatpush1.bf16.msra.mxu1 %v2765_v7  ;;  %v1486_v7 = vld [vmem:[#allocation8 + $0x1c8] sm:$0xff] }
 0x334   :  { %2262 = vmatprep.subr.bf16.mxu1 %v2774_v8  ;;  %v1490_v8 = vld [vmem:[#allocation8 + $0x1e8] sm:$0xff] }
 0x335   :  { %v2736_v52 = vcombine.high %v1486_v7, %v1490_v8 }
 0x337   :  { %2263 = vmatpush1.bf16.msra.mxu1 %v2773_v53  ;;  %v1494_v53 = vld [vmem:[#allocation8 + $0x208] sm:$0xff] }
 0x338   :  { %2264 = vmatprep.subr.bf16.mxu1 %v2782_v56  ;;  %v1498_v56 = vld [vmem:[#allocation8 + $0x228] sm:$0xff] }
 0x339   :  { %v2744_v60 = vcombine.high %v1494_v53, %v1498_v56  ;;  %v2743_v2 = vcombine.low %v1494_v53, %v1498_v56  ;;  %v1488_v56 = vld [vmem:[#allocation8 + $0x1d8] sm:$0xff] }
 0x33b   :  { %2265 = vmatpush1.bf16.msra.mxu1 %v2781_v57  ;;  %v2735_v57 = vcombine.low %v1486_v7, %v1490_v8  ;;  %v1480_v8 = vld [vmem:[#allocation8 + $0x198] sm:$0xff] }
 0x33c   :  { %2266 = vmatprep.subr.bf16.mxu1 %v2790_v1  ;;  %v1506_v1 = vld [vmem:[#allocation8 + $0x268] sm:$0xff] }
 0x33d   :  { %v2752_v5 = vcombine.high %v1502_v61, %v1506_v1  ;;  %v2751_v10 = vcombine.low %v1502_v61, %v1506_v1  ;;  %v1496_v1 = vld [vmem:[#allocation8 + $0x218] sm:$0xff] }
 0x33f   :  { %2267 = vmatpush1.bf16.msra.mxu1 %v2789_v6  ;;  %v1510_v6 = vld [vmem:[#allocation8 + $0x288] sm:$0xff] }
 0x340   :  { %2268 = vmatprep.subr.bf16.mxu1 %v2798_v19  ;;  %v2760_v13 = vcombine.high %v1510_v6, %v1514_v9  ;;  %v1522_v19 = vld [vmem:[#allocation8 + $0x2e8] sm:$0xff]  ;;  %v2759_v20 = vcombine.low %v1510_v6, %v1514_v9  ;;  %v1504_v9 = vld [vmem:[#allocation8 + $0x258] sm:$0xff] }
 0x341   :  { %v2768_v23 = vcombine.high %v1518_v14, %v1522_v19  ;;  %v2767_v28 = vcombine.low %v1518_v14, %v1522_v19  ;;  %v1512_v19 = vld [vmem:[#allocation8 + $0x298] sm:$0xff] }
 0x343   :  { %2269 = vmatpush1.bf16.msra.mxu1 %v2797_v24  ;;  %v1526_v24 = vld [vmem:[#allocation8 + $0x308] sm:$0xff] }
 0x344   :  { %2279 = vmatprep.subr.bf16.mxu1 %v2680_v12  ;;  %v2776_v34 = vcombine.high %v1526_v24, %v1530_v27  ;;  %v1538_v12 = vld [vmem:[#allocation8 + $0x368] sm:$0xff] }
 0x3d9   :  { %v1418_v17 = vpop.f32.mrb[4].mxu1 }
 0x3da   :  { %v1419_v21 = vadd.f32 %v1418_v17, %v3485_v48  ;;  %v1420_v22 = vpop.f32.mrb[5].mxu1  ;;  %v1450_v48 = vld [vmem:[#allocation8 + $0xa8] sm:$0xff]  ;;  %v2784_v17 = vcombine.high %v1534_v11, %v1538_v12 }
 0x3db   :  { %v1421_v41 = vadd.f32 %v1420_v22, %v3488_v49  ;;  %v1422_v42 = vpop.f32.mrb[6].mxu1  ;;  %v2687_v49 = vcombine.low %v1438_v29, %v1442_v30  ;;  %v2696_v43 = vcombine.high %v1446_v39, %v1450_v48  ;;  %v2695_v47 = vcombine.low %v1446_v39, %v1450_v48  ;;  %v1546_v22 = vld [vmem:[#allocation8 + $0x3a8] sm:$0xff]  ;;  %v1432_v30 = vld [vmem:[#allocation8 + $0x18] sm:$0xff] }
 0x3dc   :  { %v1425_v44 = vmax.f32 %v1419_v21, 0.0  ;;  %v1423_v25 = vpop.f32.mrb[7].mxu1  ;;  %v1542_v21 = vld [vmem:[#allocation8 + $0x388] sm:$0xff] }
 0x3dd   :  { %v1426_v26 = vmax.f32 %v1421_v41, 0.0  ;;  %v2783_v41 = vcombine.low %v1534_v11, %v1538_v12  ;;  %v2792_v42 = vcombine.high %v1542_v21, %v1546_v22  ;;  %v1554_v25 = vld [vmem:[#allocation8 + $0x3e8] sm:$0xff]  ;;  %v1528_v12 = vld [vmem:[#allocation8 + $0x318] sm:$0xff] }
 0x3de   :  { %v3499_v37 = vpack.c.bf16 %v1425_v44, %v1425_v44  ;;  %v1550_v44 = vld [vmem:[#allocation8 + $0x3c8] sm:$0xff] }
 0x3df   :  { %v3497_v35 = vpack.c.bf16 %v1426_v26, %v1426_v26  ;;  %v2791_v26 = vcombine.low %v1542_v21, %v1546_v22  ;;  %v2800_v29 = vcombine.high %v1550_v44, %v1554_v25  ;;  %v2799_v39 = vcombine.low %v1550_v44, %v1554_v25  ;;  %v1536_v22 = vld [vmem:[#allocation8 + $0x358] sm:$0xff] }
 0x3e0   :  { %v1544_v25 = vld [vmem:[#allocation8 + $0x398] sm:$0xff] }
 0x3e1   :  { %2270 = vmatprep.mubr.bf16.mxu1 %v3497_v35  ;;  %2352 = vmatprep.mubr.bf16.mxu0 %v3497_v35 }
 0x3e2   :  { %2271 = vmatmul.mubr.bf16.vlgmr.msra.gmra.mrb[8].mxu1 %v3499_v37  ;;  %2353 = vmatmul.mubr.bf16.vlgmr.msra.gmra.mrb[4].mxu0 %v3499_v37 }
 0x3e3   :  { %2280 = vmatpush1.bf16.msra.mxu1 %v2679_v16  ;;  %2311 = vmatprep.mubr.bf16.mxu1 %v3497_v35  ;;  %v2775_v16 = vcombine.low %v1526_v24, %v1530_v27  ;;  %v1520_v27 = vld [vmem:[#allocation8 + $0x2d8] sm:$0xff] }
 0x3e4   :  { %2281 = vmatprep.subr.bf16.mxu1 %v2688_v38  ;;  %v1436_v38 = vld [vmem:[#allocation8 + $0x38] sm:$0xff] }
 0x3e5   :  { %v2684_v48 = vcombine.high %v1432_v30, %v1436_v38  ;;  %v2683_v31 = vcombine.low %v1432_v30, %v1436_v38  ;;  %v1552_v38 = vld [vmem:[#allocation8 + $0x3d8] sm:$0xff] }
 0x3e7   :  { %2282 = vmatpush1.bf16.msra.mxu1 %v2687_v49  ;;  %v1440_v49 = vld [vmem:[#allocation8 + $0x58] sm:$0xff] }
 0x3e8   :  { %2283 = vmatprep.subr.bf16.mxu1 %v2696_v43  ;;  %v1444_v43 = vld [vmem:[#allocation8 + $0x78] sm:$0xff] }
 0x3e9   :  { %v2692_v46 = vcombine.high %v1440_v49, %v1444_v43  ;;  %v2691_v51 = vcombine.low %v1440_v49, %v1444_v43 }
 0x3eb   :  { %2284 = vmatpush1.bf16.msra.mxu1 %v2695_v47  ;;  %v1448_v47 = vld [vmem:[#allocation8 + $0x98] sm:$0xff] }
 0x3ec   :  { %2285 = vmatprep.subr.bf16.mxu1 %v2704_v50  ;;  %v1452_v50 = vld [vmem:[#allocation8 + $0xb8] sm:$0xff] }
 0x3ed   :  { %v2700_v55 = vcombine.high %v1448_v47, %v1452_v50  ;;  %v2699_v58 = vcombine.low %v1448_v47, %v1452_v50  ;;  %v1580_v47 = vsub.s32 5, %v3317_v15 }
 0x3ef   :  { %2286 = vmatpush1.bf16.msra.mxu1 %v2703_v32  ;;  %v1456_v32 = vld [vmem:[#allocation8 + $0xd8] sm:$0xff] }
 0x3f0   :  { %2287 = vmatprep.subr.bf16.mxu1 %v2712_v33  ;;  %v1460_v33 = vld [vmem:[#allocation8 + $0xf8] sm:$0xff] }
 0x3f1   :  { %v2708_v0 = vcombine.high %v1456_v32, %v1460_v33  ;;  %v2707_v63 = vcombine.low %v1456_v32, %v1460_v33 }
 0x3f3   :  { %2288 = vmatpush1.bf16.msra.mxu1 %v2711_v59  ;;  %v1464_v59 = vld [vmem:[#allocation8 + $0x118] sm:$0xff] }
 0x3f4   :  { %2289 = vmatprep.subr.bf16.mxu1 %v2720_v62  ;;  %v1468_v62 = vld [vmem:[#allocation8 + $0x138] sm:$0xff] }
 0x3f5   :  { %v2716_v40 = vcombine.high %v1464_v59, %v1468_v62  ;;  %v2715_v7 = vcombine.low %v1464_v59, %v1468_v62 }
 0x3f7   :  { %2290 = vmatpush1.bf16.msra.mxu1 %v2719_v3  ;;  %v1472_v3 = vld [vmem:[#allocation8 + $0x158] sm:$0xff] }
 0x3f8   :  { %2291 = vmatprep.subr.bf16.mxu1 %v2728_v4  ;;  %v1476_v4 = vld [vmem:[#allocation8 + $0x178] sm:$0xff] }
 0x3fb   :  { %2292 = vmatpush1.bf16.msra.mxu1 %v2727_v45  ;;  %v1484_v45 = vld [vmem:[#allocation8 + $0x1b8] sm:$0xff] }
 0x3fc   :  { %2293 = vmatprep.subr.bf16.mxu1 %v2736_v52  ;;  %v2723_v52 = vcombine.low %v1472_v3, %v1476_v4  ;;  %v2732_v53 = vcombine.high %v1480_v8, %v1484_v45 }
 0x3ff   :  { %2294 = vmatpush1.bf16.msra.mxu1 %v2735_v57  ;;  %v1492_v57 = vld [vmem:[#allocation8 + $0x1f8] sm:$0xff] }
 0x400   :  { %2295 = vmatprep.subr.bf16.mxu1 %v2744_v60  ;;  %v2731_v60 = vcombine.low %v1480_v8, %v1484_v45  ;;  %v2740_v61 = vcombine.high %v1488_v56, %v1492_v57 }
 0x403   :  { %2296 = vmatpush1.bf16.msra.mxu1 %v2743_v2  ;;  %v1500_v2 = vld [vmem:[#allocation8 + $0x238] sm:$0xff] }
 0x404   :  { %2297 = vmatprep.subr.bf16.mxu1 %v2752_v5  ;;  %v2739_v5 = vcombine.low %v1488_v56, %v1492_v57  ;;  %v2748_v6 = vcombine.high %v1496_v1, %v1500_v2 }
 0x407   :  { %2298 = vmatpush1.bf16.msra.mxu1 %v2751_v10  ;;  %v1508_v10 = vld [vmem:[#allocation8 + $0x278] sm:$0xff] }
 0x408   :  { %2299 = vmatprep.subr.bf16.mxu1 %v2760_v13  ;;  %v2747_v13 = vcombine.low %v1496_v1, %v1500_v2  ;;  %v2756_v14 = vcombine.high %v1504_v9, %v1508_v10 }
 0x40b   :  { %2300 = vmatpush1.bf16.msra.mxu1 %v2759_v20  ;;  %v1516_v20 = vld [vmem:[#allocation8 + $0x2b8] sm:$0xff] }
 0x40c   :  { %2301 = vmatprep.subr.bf16.mxu1 %v2768_v23  ;;  %v2755_v23 = vcombine.low %v1504_v9, %v1508_v10  ;;  %v2764_v24 = vcombine.high %v1512_v19, %v1516_v20 }
 0x40f   :  { %2302 = vmatpush1.bf16.msra.mxu1 %v2767_v28  ;;  %v1524_v28 = vld [vmem:[#allocation8 + $0x2f8] sm:$0xff] }
 0x410   :  { %2303 = vmatprep.subr.bf16.mxu1 %v2776_v34  ;;  %v2763_v34 = vcombine.low %v1512_v19, %v1516_v20  ;;  %v2772_v11 = vcombine.high %v1520_v27, %v1524_v28 }
 0x413   :  { %2304 = vmatpush1.bf16.msra.mxu1 %v2775_v16  ;;  %v1532_v16 = vld [vmem:[#allocation8 + $0x338] sm:$0xff] }
 0x414   :  { %2305 = vmatprep.subr.bf16.mxu1 %v2784_v17  ;;  %v2771_v17 = vcombine.low %v1520_v27, %v1524_v28  ;;  %v2780_v21 = vcombine.high %v1528_v12, %v1532_v16 }
 0x417   :  { %2306 = vmatpush1.bf16.msra.mxu1 %v2783_v41  ;;  %v1540_v41 = vld [vmem:[#allocation8 + $0x378] sm:$0xff] }
 0x418   :  { %2307 = vmatprep.subr.bf16.mxu1 %v2792_v42  ;;  %v2779_v42 = vcombine.low %v1528_v12, %v1532_v16  ;;  %v2788_v44 = vcombine.high %v1536_v22, %v1540_v41 }
 0x41b   :  { %2308 = vmatpush1.bf16.msra.mxu1 %v2791_v26  ;;  %v1548_v26 = vld [vmem:[#allocation8 + $0x3b8] sm:$0xff] }
 0x41c   :  { %2309 = vmatprep.subr.bf16.mxu1 %v2800_v29  ;;  %v2787_v29 = vcombine.low %v1536_v22, %v1540_v41  ;;  %v2796_v30 = vcombine.high %v1544_v25, %v1548_v26 }
 0x41f   :  { %2310 = vmatpush1.bf16.msra.mxu1 %v2799_v39  ;;  %v1556_v39 = vld [vmem:[#allocation8 + $0x3f8] sm:$0xff] }
 0x420   :  { %2361 = vmatprep.subr.bf16.mxu1 %v2684_v48  ;;  %v2795_v48 = vcombine.low %v1544_v25, %v1548_v26  ;;  %v2804_v49 = vcombine.high %v1552_v38, %v1556_v39  ;;  %v2803_v43 = vcombine.low %v1552_v38, %v1556_v39 }
 0x422   :  { %2312 = vmatmul.mubr.bf16.vlgmr.msra.gmra.mrb[12].mxu1 %v3499_v37 }
 0x423   :  { %2362 = vmatpush1.bf16.msra.mxu1 %v2683_v31  ;;  %2393 = vmatprep.mubr.bf16.mxu1 %v3497_v35  ;;  %v2724_v35 = vcombine.high %v1472_v3, %v1476_v4  ;;  %v1576_v31 = vsub.s32 4, %v3317_v15 }
 0x424   :  { %2363 = vmatprep.subr.bf16.mxu1 %v2692_v46  ;;  %v84_v46 = vld [vmem:[%s3549_s6] sm:$0xff] }
 0x425   :  { %v1561_v50 = vrot.slane %v84_v46, %v3436_v54  ;;  %v1581_v32 = vrot.slane %v84_v46, %v1580_v47 }
 0x427   :  { %2364 = vmatpush1.bf16.msra.mxu1 %v2691_v51  ;;  %v1577_v51 = vrot.slane %v84_v46, %v1576_v31 }
 0x428   :  { %2365 = vmatprep.subr.bf16.mxu1 %v2700_v55  ;;  %v1565_v55 = vrot.slane %v84_v46, %v3442_v36  ;;  %v1572_v36 = vsub.s32 3, %v3317_v15 }
 0x42a   :  { %v1573_v57 = vrot.slane %v84_v46, %v1572_v36 }
 0x42b   :  { %2366 = vmatpush1.bf16.msra.mxu1 %v2699_v58 }
 0x42c   :  { %2367 = vmatprep.subr.bf16.mxu1 %v2708_v0 }
 0x42f   :  { %2368 = vmatpush1.bf16.msra.mxu1 %v2707_v63 }
 0x430   :  { %2369 = vmatprep.subr.bf16.mxu1 %v2716_v40 }
 0x433   :  { %2370 = vmatpush1.bf16.msra.mxu1 %v2715_v7 }
 0x434   :  { %2371 = vmatprep.subr.bf16.mxu1 %v2724_v35 }
 0x437   :  { %2372 = vmatpush1.bf16.msra.mxu1 %v2723_v52 }
 0x438   :  { %2373 = vmatprep.subr.bf16.mxu1 %v2732_v53  ;;  %v1568_v53 = vsub.s32 2, %v3317_v15 }
 0x43a   :  { %v1569_v56 = vrot.slane %v84_v46, %v1568_v53 }
 0x43b   :  { %2374 = vmatpush1.bf16.msra.mxu1 %v2731_v60 }
 0x43c   :  { %2375 = vmatprep.subr.bf16.mxu1 %v2740_v61 }
 0x43f   :  { %2376 = vmatpush1.bf16.msra.mxu1 %v2739_v5 }
 0x440   :  { %2377 = vmatprep.subr.bf16.mxu1 %v2748_v6 }
 0x443   :  { %2378 = vmatpush1.bf16.msra.mxu1 %v2747_v13 }
 0x444   :  { %2379 = vmatprep.subr.bf16.mxu1 %v2756_v14 }
 0x447   :  { %2380 = vmatpush1.bf16.msra.mxu1 %v2755_v23 }
 0x448   :  { %2381 = vmatprep.subr.bf16.mxu1 %v2764_v24 }
 0x44b   :  { %2382 = vmatpush1.bf16.msra.mxu1 %v2763_v34  ;;  %v1584_v34 = vsub.s32 6, %v3317_v15 }
 0x44c   :  { %2383 = vmatprep.subr.bf16.mxu1 %v2772_v11  ;;  %v1588_v11 = vsub.s32 7, %v3317_v15 }
 0x44d   :  { %v1585_v12 = vrot.slane %v84_v46, %v1584_v34 }
 0x44e   :  { %v1589_v16 = vrot.slane %v84_v46, %v1588_v11 }
 0x44f   :  { %2384 = vmatpush1.bf16.msra.mxu1 %v2771_v17 }
 0x450   :  { %2385 = vmatprep.subr.bf16.mxu1 %v2780_v21 }
 0x453   :  { %2386 = vmatpush1.bf16.msra.mxu1 %v2779_v42 }
 0x454   :  { %2387 = vmatprep.subr.bf16.mxu1 %v2788_v44 }
 0x457   :  { %2388 = vmatpush1.bf16.msra.mxu1 %v2787_v29 }
 0x458   :  { %2389 = vmatprep.subr.bf16.mxu1 %v2796_v30 }
 0x45b   :  { %2390 = vmatpush1.bf16.msra.mxu1 %v2795_v48 }
 0x45c   :  { %2391 = vmatprep.subr.bf16.mxu1 %v2804_v49 }
 0x45f   :  { %2392 = vmatpush1.bf16.msra.mxu1 %v2803_v43 }
 0x462   :  { %2394 = vmatmul.mubr.bf16.vlgmr.msra.gmra.mrb[16].mxu1 %v3499_v37 }
 0x4b5   :  { %v2272_v33 = vpop.f32.mrb[8].mxu1  ;;  %v2354_v58 = vpop.f32.mrb[4].mxu0 }
 0x4b6   :  { %v2273_v0 = vadd.f32 %v2272_v33, %v1561_v50  ;;  %v2355_v59 = vadd.f32 %v2354_v58, %v1577_v51  ;;  %v2274_v62 = vpop.f32.mrb[9].mxu1  ;;  %v2356_v37 = vpop.f32.mrb[5].mxu0 }
 0x4b7   :  { %v2275_v63 = vadd.f32 %v2274_v62, %v1565_v55  ;;  %v2357_v40 = vadd.f32 %v2356_v37, %v1581_v32  ;;  %v2276_v3 = vpop.f32.mrb[10].mxu1  ;;  %v2358_v4 = vpop.f32.mrb[6].mxu0 }
 0x4b8   :  { %v2277_v7 = vpop.f32.mrb[11].mxu1  ;;  %v2359_v35 = vpop.f32.mrb[7].mxu0 }
 0x4b9   :  { %v2410_v8 = vcombine.low %v2273_v0, %v2275_v63  ;;  %v2411_v45 = vcombine.high %v2273_v0, %v2275_v63  ;;  %v2446_v52 = vcombine.low %v2355_v59, %v2357_v40  ;;  %v2447_v54 = vcombine.high %v2355_v59, %v2357_v40 }
 0x4bb   :  { %v2420_v13 = vrot.slane %v2410_v8, %v3320_v18  ;;  %v2427_v14 = vrot.slane %v2411_v45, %v3320_v18  ;;  %v2456_v29 = vrot.slane %v2446_v52, %v3320_v18  ;;  %v2463_v30 = vrot.slane %v2447_v54, %v3320_v18 }
 0x4f5   :  { %v2313_v60 = vpop.f32.mrb[12].mxu1 }
 0x4f6   :  { %v2314_v61 = vadd.f32 %v2313_v60, %v1569_v56  ;;  %v2315_v1 = vpop.f32.mrb[13].mxu1 }
 0x4f7   :  { %v2316_v2 = vadd.f32 %v2315_v1, %v1573_v57  ;;  %v2317_v5 = vpop.f32.mrb[14].mxu1 }
 0x4f8   :  { %v2318_v6 = vpop.f32.mrb[15].mxu1 }
 0x4f9   :  { %v2412_v9 = vcombine.low %v2314_v61, %v2316_v2  ;;  %v2413_v10 = vcombine.high %v2314_v61, %v2316_v2 }
 0x4fb   :  { %v2434_v19 = vrot.slane %v2412_v9, %v3320_v18  ;;  %v2441_v20 = vrot.slane %v2413_v10, %v3320_v18 }
 0x4fd   :  { %v2442_v23 = vcombine.low %v2420_v13, %v2434_v19  ;;  %v2443_v24 = vcombine.high %v2420_v13, %v2434_v19  ;;  %v2444_v27 = vcombine.low %v2427_v14, %v2441_v20  ;;  %v2445_v28 = vcombine.high %v2427_v14, %v2441_v20 }
 0x4ff   :  { %2490 = vst [vmem:[#allocation10] sm:$0xff] %v2442_v23  ;;  %2492 = vst [vmem:[#allocation10 + $0x10] sm:$0xff] %v2443_v24 }
 0x500   :  { %2494 = vst [vmem:[#allocation10 + $0x20] sm:$0xff] %v2444_v27  ;;  %2496 = vst [vmem:[#allocation10 + $0x30] sm:$0xff] %v2445_v28 }
 0x535   :  { %v2395_v17 = vpop.f32.mrb[16].mxu1 }
 0x536   :  { %v2396_v21 = vadd.f32 %v2395_v17, %v1585_v12  ;;  %v2397_v22 = vpop.f32.mrb[17].mxu1 }
 0x537   :  { %v2398_v41 = vadd.f32 %v2397_v22, %v1589_v16  ;;  %v2399_v42 = vpop.f32.mrb[18].mxu1 }
 0x538   :  { %v2400_v44 = vpop.f32.mrb[19].mxu1 }
 0x539   :  { %v2448_v25 = vcombine.low %v2396_v21, %v2398_v41  ;;  %v2449_v26 = vcombine.high %v2396_v21, %v2398_v41 }
 0x53b   :  { %v2470_v38 = vrot.slane %v2448_v25, %v3320_v18  ;;  %v2477_v39 = vrot.slane %v2449_v26, %v3320_v18 }
 0x53d   :  { %v2478_v48 = vcombine.low %v2456_v29, %v2470_v38  ;;  %v2479_v15 = vcombine.high %v2456_v29, %v2470_v38  ;;  %v2480_v49 = vcombine.low %v2463_v30, %v2477_v39  ;;  %v2481_v43 = vcombine.high %v2463_v30, %v2477_v39 }
 0x53f   :  { %2491 = vst [vmem:[#allocation10 + $0x8] sm:$0xff] %v2478_v48  ;;  %2493 = vst [vmem:[#allocation10 + $0x18] sm:$0xff] %v2479_v15 }
 0x540   :  { %2495 = vst [vmem:[#allocation10 + $0x28] sm:$0xff] %v2480_v49  ;;  %2497 = vst [vmem:[#allocation10 + $0x38] sm:$0xff] %v2481_v43 }
 0x541   :  { %2502 = vsyncadd [#allocation4], 768  ;;  %s3212_s6 = smov [#allocation10]  }
 0x542   :  { %s2503_s13 = sshll.u32 %s3212_s6, 4  ;;  %s2504_s13 = int_to_ptr.vmem [resolvable:$true] %s2503_s13 }
 0x543   :  { %s3171_s14 = scalar_lea.vmem %s2504_s13, 256  ;;  %s3175_s15 = scalar_lea.vmem %s2504_s13, 1024 }
 0x544   :  { %p3172_p4 = scmp.ne.s32.totalorder %s2504_s13, %s3171_s14  ;;  %p3176_p5 = scmp.lt.s32.totalorder %s2504_s13, %s2504_s13 }
 0x545   :  { %p3177_p6 = scmp.lt.s32.totalorder %s3175_s15, %s3171_s14 }
 0x547   :  { %p3178_p7 = por %p3177_p6, %p3176_p5 }
 0x549   :  { %p3179_p8 = pnand %p3178_p7, %p3172_p4 }
 0x54b   :  { %3182 = shalt.err (!%p3179_p8)
}
 0x54c   :  { %s3183_s19 = scalar_lea.hbm %s3550_s7, 256 }
 0x54d   :  { %p3184_p9 = scmp.ne.s32.totalorder %s3550_s7, %s3183_s19  ;;  %p3187_p10 = scmp.lt.u32.totalorder %s3183_s19, %s3550_s7 }
 0x54f   :  { %p3189_p11 = pnand %p3187_p10, %p3184_p9 }
 0x551   :  { %3192 = shalt.err (!%p3189_p11)
}
 0x552   :  { %2509 = dma.vmem_to_hbm [thread:$0]  %s2504_s13, 256, %s3550_s7, [#allocation4], %s3205_s25, %s3205_s25, %s3206_s26  }
 0x553   :  { %3199 = dma.done.wait [#allocation4], 1024  }
 0x554   :  { %3200 = vsyncadd [#allocation4], 4294966272 }
 0x555   :  { %2513 = vsyncpa [#allocation3], 1 }
 0x556   :  { %2514 = vsyncpa [#allocation6], 1 }
 0x557   :  { %2515 = vsyncpa [#allocation9], 1 }
 0x558   :  { %2516 = vsyncpa [#allocation4], 1 }

</bundles_post_ra>
